<compile_context>
chip_gen: v7x
topology: tpu7x:2x2x1
jax: 0.10.0
libtpu: 0.0.40
codegen_flags: <defaults>
</compile_context>

<pallas_src>
import jax
import jax.numpy as jnp
import numpy as np
from jax.experimental import pallas as pl
from jax.experimental.pallas import tpu as pltpu

BN_EPS = 1e-5  # PyTorch BatchNorm2d default

# --------------------------- small test configuration --------------------------- #
# CNN_LN(in_shape=[4, 8, 16, 16, 32, 16], out_shape=[8, 16, 32, 32, 16],
#        kernel_size=[3, 3, 3], stride=[2, 1, 1], pool kernel 2).
# Input (2, 4, 18, 18): conv1(s=2)->8x8, pool->4x4, conv2(s=1)->2x2, pool->1x1,
# flatten = 16 = l1.in_features.
B = 2
H_IN = W_IN = 18
C_IN = 4
C1 = 8                               # conv1 out channels
C2 = 16                              # conv2 out channels
K = 3                                # conv kernel size
H1 = W1 = (H_IN - K) // 2 + 1        # 8   (conv1, stride 2)
HP1 = WP1 = H1 // 2                  # 4   (pool1)
H2 = W2 = HP1 - K + 1                # 2   (conv2, stride 1)
HID1, HID2 = 32, 16
N_CLASSES = 5

NR1, WC1 = B * H1, W1 * C1           # conv1 activation tile (16, 64)
NP1, WPC1 = B * HP1, WP1 * C1        # pool1 output tile     (8, 32)
NR2, WC2 = B * H2, W2 * C2           # conv2 activation tile (4, 32)


# ------------- constant-slab layout (ALL params in ONE lane-dense slab) ---------- #
def _build_layout():
    segs = [
        ("w1cat", (W_IN * C_IN, K * WC1)),   # (72, 192) folded conv1 taps
        ("g1",    (K * NR1, B * H_IN)),      # (48, 36)  conv1 row-gather selectors
        ("m1",    (WC1, WC1)),               # (64, 64)  BN1 channel tile-sum matrix
        ("gb1",   (2, WC1)),                 # [gamma; beta] tiled over (w, c)
        ("rp1",   (2 * NP1, NR1)),           # (16, 16)  pool1 row selectors (stacked)
        ("cp1",   (WC1, 2 * WPC1)),          # (64, 64)  pool1 col selectors (stacked)
        ("w2cat", (WPC1, K * WC2)),          # (32, 96)  folded conv2 taps
        ("g2",    (K * NR2, NP1)),           # (12, 8)   conv2 row-gather selectors
        ("m2",    (WC2, WC2)),               # (32, 32)
        ("gb2",   (2, WC2)),
        ("rp2",   (2 * B, NR2)),             # (4, 4)    pool2 row selectors
        ("wl1",   (C2, HID1)),
        ("bl1",   (1, HID1)),
        ("wl2",   (HID1, HID2)),
        ("bl2",   (1, HID2)),
        ("wl3",   (HID2, N_CLASSES)),
        ("bl3",   (1, N_CLASSES)),
    ]
    offs, row = {}, 0
    for name, (h, w) in segs:
        offs[name] = (row, (h, w))
        row += -(-h // 8) * 8                # 8-aligned row starts (clean sublane loads)
    return offs, -(-row // 8) * 8


_OFFS, SLAB_H = _build_layout()
SLAB_W = 256                                 # lane-dense (multiple of 128), >= widest seg (192)


# --------------------------------- fused kernel --------------------------------- #
def _cnn_fused_kernel(x_ref, slab_ref, out_ref, u_ref):
    f32 = jnp.float32

    def mm(a, b):
        # f32 data path, HIGHEST precision passes on the MXU (protects 1e-3 tol).
        return jnp.dot(a, b, preferred_element_type=f32,
                       precision=jax.lax.Precision.HIGHEST)

    def seg(name):
        r0, (h, w) = _OFFS[name]             # static python ints -> free static slice
        return slab_ref[r0:r0 + h, 0:w]

    x = x_ref[...].astype(f32)               # (B*H_IN, W_IN*C_IN) = (36, 72)

    # ---- conv1 (stride 2): ONE folded-weight contraction over (w, c, kx), then
    # ---- K=3 row-gather selector matmuls over ky.  Bias dropped (cancelled by BN).
    z1 = mm(x, seg("w1cat"))                                  # (36, K*W1*C1) = (36, 192)
    g1 = seg("g1")                                            # (K*NR1, B*H_IN) = (48, 36)
    acc1 = mm(g1[0:NR1, :], z1[:, 0:WC1])
    for ky in range(1, K):
        acc1 = acc1 + mm(g1[ky * NR1:(ky + 1) * NR1, :],
                         z1[:, ky * WC1:(ky + 1) * WC1])      # (16, 64)

    # ---- BatchNorm1 (training batch stats, ONE fused stats matmul) + ReLU --------
    n1 = float(B * H1 * W1)
    srow1 = jnp.concatenate([jnp.sum(acc1, axis=0, keepdims=True),
                             jnp.sum(acc1 * acc1, axis=0, keepdims=True)], axis=0)
    stats1 = mm(srow1, seg("m1"))                             # (2, 64) tiled channel sums
    gb1 = seg("gb1")                                          # [gamma; beta] tiled
    mean1 = stats1[0:1, :] * (1.0 / n1)
    var1 = stats1[1:2, :] * (1.0 / n1) - mean1 * mean1
    scale1 = gb1[0:1, :] * jax.lax.rsqrt(var1 + BN_EPS)
    shift1 = gb1[1:2, :] - mean1 * scale1
    r1 = jnp.maximum(acc1 * scale1 + shift1, 0.0)             # (16, 64)

    # ---- maxpool1 2x2: 2 selector matmuls + VPU maxes of the stacked halves ------
    t = mm(seg("rp1"), r1)                                    # (2*NP1, 64)
    t1 = jnp.maximum(t[0:NP1, :], t[NP1:2 * NP1, :])          # (8, 64)  rows pooled
    u1 = mm(t1, seg("cp1"))                                   # (8, 2*WPC1) = (8, 64)
    p1 = jnp.maximum(u1[:, 0:WPC1], u1[:, WPC1:2 * WPC1])     # (8, 32)  cols pooled

    # ---- conv2 (stride 1): same folded-weight + row-gather structure -------------
    z2 = mm(p1, seg("w2cat"))                                 # (8, K*W2*C2) = (8, 96)
    g2 = seg("g2")                                            # (12, 8)
    acc2 = mm(g2[0:NR2, :], z2[:, 0:WC2])
    for ky in range(1, K):
        acc2 = acc2 + mm(g2[ky * NR2:(ky + 1) * NR2, :],
                         z2[:, ky * WC2:(ky + 1) * WC2])      # (4, 32)

    # ---- BatchNorm2 + ReLU --------------------------------------------------------
    n2 = float(B * H2 * W2)
    srow2 = jnp.concatenate([jnp.sum(acc2, axis=0, keepdims=True),
                             jnp.sum(acc2 * acc2, axis=0, keepdims=True)], axis=0)
    stats2 = mm(srow2, seg("m2"))                             # (2, 32)
    gb2 = seg("gb2")
    mean2 = stats2[0:1, :] * (1.0 / n2)
    var2 = stats2[1:2, :] * (1.0 / n2) - mean2 * mean2
    scale2 = gb2[0:1, :] * jax.lax.rsqrt(var2 + BN_EPS)
    shift2 = gb2[1:2, :] - mean2 * scale2
    r2 = jnp.maximum(acc2 * scale2 + shift2, 0.0)             # (4, 32)

    # ---- maxpool2 2x2 -> (B, C2): 1 row-selector matmul, column step is a free
    # ---- halves-max (W2 == 2 so the column selector is the identity).
    t2f = mm(seg("rp2"), r2)                                  # (2*B, 32)
    t2 = jnp.maximum(t2f[0:B, :], t2f[B:2 * B, :])            # (2, 32)
    flat = jnp.maximum(t2[:, 0:C2], t2[:, C2:2 * C2])         # (2, 16) == torch.flatten

    # ---- linear stack --------------------------------------------------------------
    h1 = jnp.maximum(mm(flat, seg("wl1")) + seg("bl1"), 0.0)  # (2, 32)
    h2 = jnp.maximum(mm(h1, seg("wl2")) + seg("bl2"), 0.0)    # (2, 16)
    h3 = jnp.maximum(mm(h2, seg("wl3")) + seg("bl3"), 0.0)    # (2, 5)

    u_ref[...] = h2
    out_ref[...] = h3


# ---------------------------- one-time parameter prep --------------------------- #
def prepare_params(params):
    """Fold all weight layouts / selector matrices into ONE lane-dense f32 slab."""
    w1 = np.asarray(params["conv1"]["w"], np.float32)   # (C1, C_IN, K, K)
    w2 = np.asarray(params["conv2"]["w"], np.float32)   # (C2, C1, K, K)

    slab = np.zeros((SLAB_H, SLAB_W), np.float32)

    def put(name, arr):
        r0, (h, w) = _OFFS[name]
        assert arr.shape == (h, w), (name, arr.shape, (h, w))
        slab[r0:r0 + h, :w] = arr

    # conv1 folded taps: [w*C_IN+c, ky*W1*C1 + j*C1 + o] = w1[o, c, ky, w-2j]
    w1cat = np.zeros((W_IN * C_IN, K * WC1), np.float32)
    for ky in range(K):
        for j in range(W1):
            for kx in range(K):
                col = 2 * j + kx
                w1cat[col * C_IN:(col + 1) * C_IN,
                      ky * WC1 + j * C1: ky * WC1 + (j + 1) * C1] = w1[:, :, ky, kx].T
    put("w1cat", w1cat)

    # conv1 row-gather selectors (stacked over ky): pick row 2i+ky per (b, i)
    g1 = np.zeros((K * NR1, B * H_IN), np.float32)
    for ky in range(K):
        for b in range(B):
            for i in range(H1):
                g1[ky * NR1 + b * H1 + i, b * H_IN + 2 * i + ky] = 1.0
    put("g1", g1)

    # per-channel tile-sum matrices for BN stats in the fused (w, c) column layout
    put("m1", np.kron(np.ones((W1, W1), np.float32), np.eye(C1, dtype=np.float32)))
    put("m2", np.kron(np.ones((W2, W2), np.float32), np.eye(C2, dtype=np.float32)))

    # BN affines, tiled over the (w, channel) column axis.  Conv biases are dropped:
    # training-mode BN subtracts the batch mean, so a per-channel constant cancels.
    gb1 = np.stack([np.tile(np.asarray(params["conv1"]["gamma"], np.float32), W1),
                    np.tile(np.asarray(params["conv1"]["beta"], np.float32), W1)])
    gb2 = np.stack([np.tile(np.asarray(params["conv2"]["gamma"], np.float32), W2),
                    np.tile(np.asarray(params["conv2"]["beta"], np.float32), W2)])
    put("gb1", gb1)
    put("gb2", gb2)

    # pool1 selectors (parity-stacked so each pool is 2 matmuls + a halves-max)
    rp1 = np.zeros((2 * NP1, NR1), np.float32)
    for par in range(2):
        for b in range(B):
            for i in range(HP1):
                rp1[par * NP1 + b * HP1 + i, b * H1 + 2 * i + par] = 1.0
    put("rp1", rp1)
    cp1 = np.zeros((WC1, 2 * WPC1), np.float32)
    for par in range(2):
        for j in range(WP1):
            for ch in range(C1):
                cp1[(2 * j + par) * C1 + ch, par * WPC1 + j * C1 + ch] = 1.0
    put("cp1", cp1)

    # conv2 folded taps: [w*C1+c, ky*W2*C2 + j*C2 + o] = w2[o, c, ky, w-j]
    w2cat = np.zeros((WPC1, K * WC2), np.float32)
    for ky in range(K):
        for j in range(W2):
            for kx in range(K):
                col = j + kx
                w2cat[col * C1:(col + 1) * C1,
                      ky * WC2 + j * C2: ky * WC2 + (j + 1) * C2] = w2[:, :, ky, kx].T
    put("w2cat", w2cat)

    # conv2 row-gather selectors
    g2 = np.zeros((K * NR2, NP1), np.float32)
    for ky in range(K):
        for b in range(B):
            for i in range(H2):
                g2[ky * NR2 + b * H2 + i, b * HP1 + i + ky] = 1.0
    put("g2", g2)

    # pool2 row selector
    rp2 = np.zeros((2 * B, NR2), np.float32)
    for par in range(2):
        for b in range(B):
            rp2[par * B + b, b * H2 + par] = 1.0
    put("rp2", rp2)

    # linear stack
    put("wl1", np.asarray(params["l1"]["w"], np.float32).T)
    put("bl1", np.asarray(params["l1"]["b"], np.float32).reshape(1, -1))
    put("wl2", np.asarray(params["l2"]["w"], np.float32).T)
    put("bl2", np.asarray(params["l2"]["b"], np.float32).reshape(1, -1))
    put("wl3", np.asarray(params["l3"]["w"], np.float32).T)
    put("bl3", np.asarray(params["l3"]["b"], np.float32).reshape(1, -1))

    return jnp.asarray(slab)


# --------------------------------- CNN_LN forward -------------------------------- #
@jax.jit
def cnn_ln_forward(slab, x_nchw):
    # Only wrapper glue: NCHW -> one lane-dense NHWC slab (rows b*H, cols w*C_in).
    # The stride-2 phase handling lives entirely inside the kernel's selectors/weights.
    x = jnp.transpose(x_nchw, (0, 2, 3, 1)).reshape(B * H_IN, W_IN * C_IN)
    x = x.astype(jnp.float32)

    out, u = pl.pallas_call(
        _cnn_fused_kernel,
        out_shape=(jax.ShapeDtypeStruct((B, N_CLASSES), jnp.float32),
                   jax.ShapeDtypeStruct((B, HID2), jnp.float32)),
        grid=(1,),
        in_specs=[pl.BlockSpec((B * H_IN, W_IN * C_IN), lambda i: (0, 0)),
                  pl.BlockSpec((SLAB_H, SLAB_W), lambda i: (0, 0))],
        out_specs=(pl.BlockSpec((B, N_CLASSES), lambda i: (0, 0)),
                   pl.BlockSpec((B, HID2), lambda i: (0, 0))),
        compiler_params=pltpu.CompilerParams(dimension_semantics=("arbitrary",)),
    )(x, slab)
    return out, u
    # TODO(synk): BatchNorm running-statistics update is a training side effect with
    # no returned value; it is intentionally not reproduced.


# ------------------------------- pure-JAX reference ------------------------------ #
def reference_forward(params, x_nchw):
    hp = jax.lax.Precision.HIGHEST

    def conv_bn_relu_ref(x, p, stride):
        y = jax.lax.conv_general_dilated(
            x, p["w"], window_strides=(stride, stride), padding="VALID",
            dimension_numbers=("NCHW", "OIHW", "NCHW"), precision=hp)
        y = y + p["b"][None, :, None, None]
        mean = jnp.mean(y, axis=(0, 2, 3), keepdims=True)
        var = jnp.mean((y - mean) ** 2, axis=(0, 2, 3), keepdims=True)
        yhat = (y - mean) / jnp.sqrt(var + BN_EPS)
        return jnp.maximum(yhat * p["gamma"][None, :, None, None]
                           + p["beta"][None, :, None, None], 0.0)

    def pool_ref(x):
        b, c, h, w = x.shape
        ho, wo = h // 2, w // 2
        return jnp.max(x[:, :, :ho * 2, :wo * 2].reshape(b, c, ho, 2, wo, 2), axis=(3, 5))

    def lin(x, p):
        return jnp.maximum(jnp.dot(x, p["w"].T, precision=hp) + p["b"], 0.0)

    x = pool_ref(conv_bn_relu_ref(x_nchw, params["conv1"], 2))
    x = pool_ref(conv_bn_relu_ref(x, params["conv2"], 1))
    x = x.reshape(x.shape[0], -1)
    x = lin(x, params["l1"])
    x = lin(x, params["l2"])
    u = x
    x = lin(x, params["l3"])
    return x, u


# -------------------------------------- main -------------------------------------- #
if __name__ == "__main__":
    key = jax.random.PRNGKey(0)
    ks = jax.random.split(key, 16)

    def rnd(k, shape, scale=0.1):
        return scale * jax.random.normal(k, shape, jnp.float32)

    params = {
        "conv1": {"w": rnd(ks[0], (C1, C_IN, K, K)), "b": rnd(ks[1], (C1,)),
                  "gamma": 1.0 + rnd(ks[2], (C1,)), "beta": rnd(ks[3], (C1,))},
        "conv2": {"w": rnd(ks[4], (C2, C1, K, K)), "b": rnd(ks[5], (C2,)),
                  "gamma": 1.0 + rnd(ks[6], (C2,)), "beta": rnd(ks[7], (C2,))},
        "l1": {"w": rnd(ks[8], (HID1, C2)), "b": rnd(ks[9], (HID1,))},
        "l2": {"w": rnd(ks[10], (HID2, HID1)), "b": rnd(ks[11], (HID2,))},
        "l3": {"w": rnd(ks[12], (N_CLASSES, HID2)), "b": rnd(ks[13], (N_CLASSES,))},
    }

    x = jax.random.normal(ks[14], (B, C_IN, H_IN, W_IN), jnp.float32)

    slab = prepare_params(params)            # one-time layout folding into ONE slab
    out, u_align = cnn_ln_forward(slab, x)
    out = jax.block_until_ready(out)
    u_align = jax.block_until_ready(u_align)

    ref_out, ref_u = reference_forward(params, x)
    np.testing.assert_allclose(np.asarray(out), np.asarray(ref_out), rtol=1e-3, atol=1e-3)
    np.testing.assert_allclose(np.asarray(u_align), np.asarray(ref_u), rtol=1e-3, atol=1e-3)
    assert out.shape == (B, N_CLASSES) and u_align.shape == (B, HID2)

    print("KERNEL_OK")
</pallas_src>

<mosaic_0001>
module attributes {stable_mosaic.version = 11 : i64} {
  func.func @_cnn_fused_kernel(%arg0: i32, %arg1: memref<36x72xf32, #tpu.memory_space<vmem>>, %arg2: memref<456x256xf32, #tpu.memory_space<vmem>>, %arg3: memref<2x5xf32, #tpu.memory_space<vmem>>, %arg4: memref<2x16xf32, #tpu.memory_space<vmem>>) attributes {dimension_semantics = [#tpu.dimension_semantics<arbitrary>], iteration_bounds = array<i64: 1>, scalar_prefetch = 0 : i64, scratch_operands = 0 : i64, tpu.core_type = #tpu.core_type<tc>, window_params = [{pipeline_mode = #tpu.pipeline_mode<synchronous>, transform_indices = @transform_0, window_bounds = array<i64: 36, 72>}, {pipeline_mode = #tpu.pipeline_mode<synchronous>, transform_indices = @transform_1, window_bounds = array<i64: 456, 256>}, {pipeline_mode = #tpu.pipeline_mode<synchronous>, transform_indices = @transform_2, window_bounds = array<i64: 2, 5>}, {pipeline_mode = #tpu.pipeline_mode<synchronous>, transform_indices = @transform_3, window_bounds = array<i64: 2, 16>}]} {
    %c0 = arith.constant 0 : index
    %c0_0 = arith.constant 0 : index
    %0 = vector.load %arg1[%c0, %c0_0] : memref<36x72xf32, #tpu.memory_space<vmem>>, vector<36x72xf32>
    %c0_1 = arith.constant 0 : index
    %c0_2 = arith.constant 0 : index
    %1 = vector.load %arg2[%c0_1, %c0_2] : memref<456x256xf32, #tpu.memory_space<vmem>>, vector<72x192xf32>
    %cst = arith.constant dense<0.000000e+00> : vector<36x192xf32>
    %2 = tpu.matmul %0, %1, %cst {dimension_numbers = #tpu.dot_dimension_numbers<[1], [0], [0], [1], [0, 0, 1, 1], [], []>, precision = #tpu.contract_precision<fp32>} : vector<36x72xf32>, vector<72x192xf32>, vector<36x192xf32> -> vector<36x192xf32>
    %c72 = arith.constant 72 : index
    %c0_3 = arith.constant 0 : index
    %3 = vector.load %arg2[%c72, %c0_3] : memref<456x256xf32, #tpu.memory_space<vmem>>, vector<48x36xf32>
    %4 = vector.extract_strided_slice %3 {offsets = [0, 0], sizes = [16, 36], strides = [1, 1]} : vector<48x36xf32> to vector<16x36xf32>
    %5 = vector.extract_strided_slice %2 {offsets = [0, 0], sizes = [36, 64], strides = [1, 1]} : vector<36x192xf32> to vector<36x64xf32>
    %cst_4 = arith.constant dense<0.000000e+00> : vector<16x64xf32>
    %6 = tpu.matmul %4, %5, %cst_4 {dimension_numbers = #tpu.dot_dimension_numbers<[1], [0], [0], [1], [0, 0, 1, 1], [], []>, precision = #tpu.contract_precision<fp32>} : vector<16x36xf32>, vector<36x64xf32>, vector<16x64xf32> -> vector<16x64xf32>
    %7 = vector.extract_strided_slice %3 {offsets = [16, 0], sizes = [16, 36], strides = [1, 1]} : vector<48x36xf32> to vector<16x36xf32>
    %8 = vector.extract_strided_slice %2 {offsets = [0, 64], sizes = [36, 64], strides = [1, 1]} : vector<36x192xf32> to vector<36x64xf32>
    %cst_5 = arith.constant dense<0.000000e+00> : vector<16x64xf32>
    %9 = tpu.matmul %7, %8, %cst_5 {dimension_numbers = #tpu.dot_dimension_numbers<[1], [0], [0], [1], [0, 0, 1, 1], [], []>, precision = #tpu.contract_precision<fp32>} : vector<16x36xf32>, vector<36x64xf32>, vector<16x64xf32> -> vector<16x64xf32>
    %10 = arith.addf %6, %9 : vector<16x64xf32>
    %11 = vector.extract_strided_slice %3 {offsets = [32, 0], sizes = [16, 36], strides = [1, 1]} : vector<48x36xf32> to vector<16x36xf32>
    %12 = vector.extract_strided_slice %2 {offsets = [0, 128], sizes = [36, 64], strides = [1, 1]} : vector<36x192xf32> to vector<36x64xf32>
    %cst_6 = arith.constant dense<0.000000e+00> : vector<16x64xf32>
    %13 = tpu.matmul %11, %12, %cst_6 {dimension_numbers = #tpu.dot_dimension_numbers<[1], [0], [0], [1], [0, 0, 1, 1], [], []>, precision = #tpu.contract_precision<fp32>} : vector<16x36xf32>, vector<36x64xf32>, vector<16x64xf32> -> vector<16x64xf32>
    %14 = arith.addf %10, %13 : vector<16x64xf32>
    %cst_7 = arith.constant dense<0.000000e+00> : vector<64xf32>
    %15 = vector.multi_reduction <add>, %14, %cst_7 [0] : vector<16x64xf32> to vector<64xf32>
    %16 = vector.shape_cast %15 : vector<64xf32> to vector<1x64xf32>
    %17 = arith.mulf %14, %14 : vector<16x64xf32>
    %cst_8 = arith.constant dense<0.000000e+00> : vector<64xf32>
    %18 = vector.multi_reduction <add>, %17, %cst_8 [0] : vector<16x64xf32> to vector<64xf32>
    %19 = vector.shape_cast %18 : vector<64xf32> to vector<1x64xf32>
    %20 = tpu.concatenate %16, %19 in 0 : vector<1x64xf32>, vector<1x64xf32> -> vector<2x64xf32>
    %c120 = arith.constant 120 : index
    %c0_9 = arith.constant 0 : index
    %21 = vector.load %arg2[%c120, %c0_9] : memref<456x256xf32, #tpu.memory_space<vmem>>, vector<64x64xf32>
    %cst_10 = arith.constant dense<0.000000e+00> : vector<2x64xf32>
    %22 = tpu.matmul %20, %21, %cst_10 {dimension_numbers = #tpu.dot_dimension_numbers<[1], [0], [0], [1], [0, 0, 1, 1], [], []>, precision = #tpu.contract_precision<fp32>} : vector<2x64xf32>, vector<64x64xf32>, vector<2x64xf32> -> vector<2x64xf32>
    %c184 = arith.constant 184 : index
    %c0_11 = arith.constant 0 : index
    %23 = vector.load %arg2[%c184, %c0_11] : memref<456x256xf32, #tpu.memory_space<vmem>>, vector<2x64xf32>
    %24 = vector.extract_strided_slice %22 {offsets = [0, 0], sizes = [1, 64], strides = [1, 1]} : vector<2x64xf32> to vector<1x64xf32>
    %cst_12 = arith.constant 7.812500e-03 : f32
    %25 = vector.broadcast %cst_12 : f32 to vector<1x64xf32>
    %26 = arith.mulf %24, %25 : vector<1x64xf32>
    %27 = vector.extract_strided_slice %22 {offsets = [1, 0], sizes = [1, 64], strides = [1, 1]} : vector<2x64xf32> to vector<1x64xf32>
    %cst_13 = arith.constant 7.812500e-03 : f32
    %28 = vector.broadcast %cst_13 : f32 to vector<1x64xf32>
    %29 = arith.mulf %27, %28 : vector<1x64xf32>
    %30 = arith.mulf %26, %26 : vector<1x64xf32>
    %31 = arith.subf %29, %30 : vector<1x64xf32>
    %32 = vector.extract_strided_slice %23 {offsets = [0, 0], sizes = [1, 64], strides = [1, 1]} : vector<2x64xf32> to vector<1x64xf32>
    %cst_14 = arith.constant 9.99999974E-6 : f32
    %33 = vector.broadcast %cst_14 : f32 to vector<1x64xf32>
    %34 = arith.addf %31, %33 : vector<1x64xf32>
    %35 = math.rsqrt %34 : vector<1x64xf32>
    %36 = arith.mulf %32, %35 : vector<1x64xf32>
    %37 = vector.extract_strided_slice %23 {offsets = [1, 0], sizes = [1, 64], strides = [1, 1]} : vector<2x64xf32> to vector<1x64xf32>
    %38 = arith.mulf %26, %36 : vector<1x64xf32>
    %39 = arith.subf %37, %38 : vector<1x64xf32>
    %40 = vector.broadcast %36 : vector<1x64xf32> to vector<16x64xf32>
    %41 = arith.mulf %14, %40 : vector<16x64xf32>
    %42 = vector.broadcast %39 : vector<1x64xf32> to vector<16x64xf32>
    %43 = arith.addf %41, %42 : vector<16x64xf32>
    %cst_15 = arith.constant 0.000000e+00 : f32
    %44 = vector.broadcast %cst_15 : f32 to vector<16x64xf32>
    %45 = arith.maximumf %43, %44 : vector<16x64xf32>
    %c192 = arith.constant 192 : index
    %c0_16 = arith.constant 0 : index
    %46 = vector.load %arg2[%c192, %c0_16] : memref<456x256xf32, #tpu.memory_space<vmem>>, vector<16x16xf32>
    %cst_17 = arith.constant dense<0.000000e+00> : vector<16x64xf32>
    %47 = tpu.matmul %46, %45, %cst_17 {dimension_numbers = #tpu.dot_dimension_numbers<[1], [0], [0], [1], [0, 0, 1, 1], [], []>, precision = #tpu.contract_precision<fp32>} : vector<16x16xf32>, vector<16x64xf32>, vector<16x64xf32> -> vector<16x64xf32>
    %48 = vector.extract_strided_slice %47 {offsets = [0, 0], sizes = [8, 64], strides = [1, 1]} : vector<16x64xf32> to vector<8x64xf32>
    %49 = vector.extract_strided_slice %47 {offsets = [8, 0], sizes = [8, 64], strides = [1, 1]} : vector<16x64xf32> to vector<8x64xf32>
    %50 = arith.maximumf %48, %49 : vector<8x64xf32>
    %c208 = arith.constant 208 : index
    %c0_18 = arith.constant 0 : index
    %51 = vector.load %arg2[%c208, %c0_18] : memref<456x256xf32, #tpu.memory_space<vmem>>, vector<64x64xf32>
    %cst_19 = arith.constant dense<0.000000e+00> : vector<8x64xf32>
    %52 = tpu.matmul %50, %51, %cst_19 {dimension_numbers = #tpu.dot_dimension_numbers<[1], [0], [0], [1], [0, 0, 1, 1], [], []>, precision = #tpu.contract_precision<fp32>} : vector<8x64xf32>, vector<64x64xf32>, vector<8x64xf32> -> vector<8x64xf32>
    %53 = vector.extract_strided_slice %52 {offsets = [0, 0], sizes = [8, 32], strides = [1, 1]} : vector<8x64xf32> to vector<8x32xf32>
    %54 = vector.extract_strided_slice %52 {offsets = [0, 32], sizes = [8, 32], strides = [1, 1]} : vector<8x64xf32> to vector<8x32xf32>
    %55 = arith.maximumf %53, %54 : vector<8x32xf32>
    %c272 = arith.constant 272 : index
    %c0_20 = arith.constant 0 : index
    %56 = vector.load %arg2[%c272, %c0_20] : memref<456x256xf32, #tpu.memory_space<vmem>>, vector<32x96xf32>
    %cst_21 = arith.constant dense<0.000000e+00> : vector<8x96xf32>
    %57 = tpu.matmul %55, %56, %cst_21 {dimension_numbers = #tpu.dot_dimension_numbers<[1], [0], [0], [1], [0, 0, 1, 1], [], []>, precision = #tpu.contract_precision<fp32>} : vector<8x32xf32>, vector<32x96xf32>, vector<8x96xf32> -> vector<8x96xf32>
    %c304 = arith.constant 304 : index
    %c0_22 = arith.constant 0 : index
    %58 = vector.load %arg2[%c304, %c0_22] : memref<456x256xf32, #tpu.memory_space<vmem>>, vector<12x8xf32>
    %59 = vector.extract_strided_slice %58 {offsets = [0, 0], sizes = [4, 8], strides = [1, 1]} : vector<12x8xf32> to vector<4x8xf32>
    %60 = vector.extract_strided_slice %57 {offsets = [0, 0], sizes = [8, 32], strides = [1, 1]} : vector<8x96xf32> to vector<8x32xf32>
    %cst_23 = arith.constant dense<0.000000e+00> : vector<4x32xf32>
    %61 = tpu.matmul %59, %60, %cst_23 {dimension_numbers = #tpu.dot_dimension_numbers<[1], [0], [0], [1], [0, 0, 1, 1], [], []>, precision = #tpu.contract_precision<fp32>} : vector<4x8xf32>, vector<8x32xf32>, vector<4x32xf32> -> vector<4x32xf32>
    %62 = vector.extract_strided_slice %58 {offsets = [4, 0], sizes = [4, 8], strides = [1, 1]} : vector<12x8xf32> to vector<4x8xf32>
    %63 = vector.extract_strided_slice %57 {offsets = [0, 32], sizes = [8, 32], strides = [1, 1]} : vector<8x96xf32> to vector<8x32xf32>
    %cst_24 = arith.constant dense<0.000000e+00> : vector<4x32xf32>
    %64 = tpu.matmul %62, %63, %cst_24 {dimension_numbers = #tpu.dot_dimension_numbers<[1], [0], [0], [1], [0, 0, 1, 1], [], []>, precision = #tpu.contract_precision<fp32>} : vector<4x8xf32>, vector<8x32xf32>, vector<4x32xf32> -> vector<4x32xf32>
    %65 = arith.addf %61, %64 : vector<4x32xf32>
    %66 = vector.extract_strided_slice %58 {offsets = [8, 0], sizes = [4, 8], strides = [1, 1]} : vector<12x8xf32> to vector<4x8xf32>
    %67 = vector.extract_strided_slice %57 {offsets = [0, 64], sizes = [8, 32], strides = [1, 1]} : vector<8x96xf32> to vector<8x32xf32>
    %cst_25 = arith.constant dense<0.000000e+00> : vector<4x32xf32>
    %68 = tpu.matmul %66, %67, %cst_25 {dimension_numbers = #tpu.dot_dimension_numbers<[1], [0], [0], [1], [0, 0, 1, 1], [], []>, precision = #tpu.contract_precision<fp32>} : vector<4x8xf32>, vector<8x32xf32>, vector<4x32xf32> -> vector<4x32xf32>
    %69 = arith.addf %65, %68 : vector<4x32xf32>
    %cst_26 = arith.constant dense<0.000000e+00> : vector<32xf32>
    %70 = vector.multi_reduction <add>, %69, %cst_26 [0] : vector<4x32xf32> to vector<32xf32>
    %71 = vector.shape_cast %70 : vector<32xf32> to vector<1x32xf32>
    %72 = arith.mulf %69, %69 : vector<4x32xf32>
    %cst_27 = arith.constant dense<0.000000e+00> : vector<32xf32>
    %73 = vector.multi_reduction <add>, %72, %cst_27 [0] : vector<4x32xf32> to vector<32xf32>
    %74 = vector.shape_cast %73 : vector<32xf32> to vector<1x32xf32>
    %75 = tpu.concatenate %71, %74 in 0 : vector<1x32xf32>, vector<1x32xf32> -> vector<2x32xf32>
    %c320 = arith.constant 320 : index
    %c0_28 = arith.constant 0 : index
    %76 = vector.load %arg2[%c320, %c0_28] : memref<456x256xf32, #tpu.memory_space<vmem>>, vector<32x32xf32>
    %cst_29 = arith.constant dense<0.000000e+00> : vector<2x32xf32>
    %77 = tpu.matmul %75, %76, %cst_29 {dimension_numbers = #tpu.dot_dimension_numbers<[1], [0], [0], [1], [0, 0, 1, 1], [], []>, precision = #tpu.contract_precision<fp32>} : vector<2x32xf32>, vector<32x32xf32>, vector<2x32xf32> -> vector<2x32xf32>
    %c352 = arith.constant 352 : index
    %c0_30 = arith.constant 0 : index
    %78 = vector.load %arg2[%c352, %c0_30] : memref<456x256xf32, #tpu.memory_space<vmem>>, vector<2x32xf32>
    %79 = vector.extract_strided_slice %77 {offsets = [0, 0], sizes = [1, 32], strides = [1, 1]} : vector<2x32xf32> to vector<1x32xf32>
    %cst_31 = arith.constant 1.250000e-01 : f32
    %80 = vector.broadcast %cst_31 : f32 to vector<1x32xf32>
    %81 = arith.mulf %79, %80 : vector<1x32xf32>
    %82 = vector.extract_strided_slice %77 {offsets = [1, 0], sizes = [1, 32], strides = [1, 1]} : vector<2x32xf32> to vector<1x32xf32>
    %cst_32 = arith.constant 1.250000e-01 : f32
    %83 = vector.broadcast %cst_32 : f32 to vector<1x32xf32>
    %84 = arith.mulf %82, %83 : vector<1x32xf32>
    %85 = arith.mulf %81, %81 : vector<1x32xf32>
    %86 = arith.subf %84, %85 : vector<1x32xf32>
    %87 = vector.extract_strided_slice %78 {offsets = [0, 0], sizes = [1, 32], strides = [1, 1]} : vector<2x32xf32> to vector<1x32xf32>
    %cst_33 = arith.constant 9.99999974E-6 : f32
    %88 = vector.broadcast %cst_33 : f32 to vector<1x32xf32>
    %89 = arith.addf %86, %88 : vector<1x32xf32>
    %90 = math.rsqrt %89 : vector<1x32xf32>
    %91 = arith.mulf %87, %90 : vector<1x32xf32>
    %92 = vector.extract_strided_slice %78 {offsets = [1, 0], sizes = [1, 32], strides = [1, 1]} : vector<2x32xf32> to vector<1x32xf32>
    %93 = arith.mulf %81, %91 : vector<1x32xf32>
    %94 = arith.subf %92, %93 : vector<1x32xf32>
    %95 = vector.broadcast %91 : vector<1x32xf32> to vector<4x32xf32>
    %96 = arith.mulf %69, %95 : vector<4x32xf32>
    %97 = vector.broadcast %94 : vector<1x32xf32> to vector<4x32xf32>
    %98 = arith.addf %96, %97 : vector<4x32xf32>
    %cst_34 = arith.constant 0.000000e+00 : f32
    %99 = vector.broadcast %cst_34 : f32 to vector<4x32xf32>
    %100 = arith.maximumf %98, %99 : vector<4x32xf32>
    %c360 = arith.constant 360 : index
    %c0_35 = arith.constant 0 : index
    %101 = vector.load %arg2[%c360, %c0_35] : memref<456x256xf32, #tpu.memory_space<vmem>>, vector<4x4xf32>
    %cst_36 = arith.constant dense<0.000000e+00> : vector<4x32xf32>
    %102 = tpu.matmul %101, %100, %cst_36 {dimension_numbers = #tpu.dot_dimension_numbers<[1], [0], [0], [1], [0, 0, 1, 1], [], []>, precision = #tpu.contract_precision<fp32>} : vector<4x4xf32>, vector<4x32xf32>, vector<4x32xf32> -> vector<4x32xf32>
    %103 = vector.extract_strided_slice %102 {offsets = [0, 0], sizes = [2, 32], strides = [1, 1]} : vector<4x32xf32> to vector<2x32xf32>
    %104 = vector.extract_strided_slice %102 {offsets = [2, 0], sizes = [2, 32], strides = [1, 1]} : vector<4x32xf32> to vector<2x32xf32>
    %105 = arith.maximumf %103, %104 : vector<2x32xf32>
    %106 = vector.extract_strided_slice %105 {offsets = [0, 0], sizes = [2, 16], strides = [1, 1]} : vector<2x32xf32> to vector<2x16xf32>
    %107 = vector.extract_strided_slice %105 {offsets = [0, 16], sizes = [2, 16], strides = [1, 1]} : vector<2x32xf32> to vector<2x16xf32>
    %108 = arith.maximumf %106, %107 : vector<2x16xf32>
    %c368 = arith.constant 368 : index
    %c0_37 = arith.constant 0 : index
    %109 = vector.load %arg2[%c368, %c0_37] : memref<456x256xf32, #tpu.memory_space<vmem>>, vector<16x32xf32>
    %cst_38 = arith.constant dense<0.000000e+00> : vector<2x32xf32>
    %110 = tpu.matmul %108, %109, %cst_38 {dimension_numbers = #tpu.dot_dimension_numbers<[1], [0], [0], [1], [0, 0, 1, 1], [], []>, precision = #tpu.contract_precision<fp32>} : vector<2x16xf32>, vector<16x32xf32>, vector<2x32xf32> -> vector<2x32xf32>
    %c384 = arith.constant 384 : index
    %c0_39 = arith.constant 0 : index
    %111 = vector.load %arg2[%c384, %c0_39] : memref<456x256xf32, #tpu.memory_space<vmem>>, vector<1x32xf32>
    %112 = vector.broadcast %111 : vector<1x32xf32> to vector<2x32xf32>
    %113 = arith.addf %110, %112 : vector<2x32xf32>
    %cst_40 = arith.constant 0.000000e+00 : f32
    %114 = vector.broadcast %cst_40 : f32 to vector<2x32xf32>
    %115 = arith.maximumf %113, %114 : vector<2x32xf32>
    %c392 = arith.constant 392 : index
    %c0_41 = arith.constant 0 : index
    %116 = vector.load %arg2[%c392, %c0_41] : memref<456x256xf32, #tpu.memory_space<vmem>>, vector<32x16xf32>
    %cst_42 = arith.constant dense<0.000000e+00> : vector<2x16xf32>
    %117 = tpu.matmul %115, %116, %cst_42 {dimension_numbers = #tpu.dot_dimension_numbers<[1], [0], [0], [1], [0, 0, 1, 1], [], []>, precision = #tpu.contract_precision<fp32>} : vector<2x32xf32>, vector<32x16xf32>, vector<2x16xf32> -> vector<2x16xf32>
    %c424 = arith.constant 424 : index
    %c0_43 = arith.constant 0 : index
    %118 = vector.load %arg2[%c424, %c0_43] : memref<456x256xf32, #tpu.memory_space<vmem>>, vector<1x16xf32>
    %119 = vector.broadcast %118 : vector<1x16xf32> to vector<2x16xf32>
    %120 = arith.addf %117, %119 : vector<2x16xf32>
    %cst_44 = arith.constant 0.000000e+00 : f32
    %121 = vector.broadcast %cst_44 : f32 to vector<2x16xf32>
    %122 = arith.maximumf %120, %121 : vector<2x16xf32>
    %c432 = arith.constant 432 : index
    %c0_45 = arith.constant 0 : index
    %123 = vector.load %arg2[%c432, %c0_45] : memref<456x256xf32, #tpu.memory_space<vmem>>, vector<16x5xf32>
    %cst_46 = arith.constant dense<0.000000e+00> : vector<2x5xf32>
    %124 = tpu.matmul %122, %123, %cst_46 {dimension_numbers = #tpu.dot_dimension_numbers<[1], [0], [0], [1], [0, 0, 1, 1], [], []>, precision = #tpu.contract_precision<fp32>} : vector<2x16xf32>, vector<16x5xf32>, vector<2x5xf32> -> vector<2x5xf32>
    %c448 = arith.constant 448 : index
    %c0_47 = arith.constant 0 : index
    %125 = vector.load %arg2[%c448, %c0_47] : memref<456x256xf32, #tpu.memory_space<vmem>>, vector<1x5xf32>
    %126 = vector.broadcast %125 : vector<1x5xf32> to vector<2x5xf32>
    %127 = arith.addf %124, %126 : vector<2x5xf32>
    %cst_48 = arith.constant 0.000000e+00 : f32
    %128 = vector.broadcast %cst_48 : f32 to vector<2x5xf32>
    %129 = arith.maximumf %127, %128 : vector<2x5xf32>
    %c0_49 = arith.constant 0 : index
    %c0_50 = arith.constant 0 : index
    %130 = vector.load %arg4[%c0_49, %c0_50] : memref<2x16xf32, #tpu.memory_space<vmem>>, vector<2x16xf32>
    tpu.vector_store %arg4[%c0_49, %c0_50], %122 {strides = array<i32>} : memref<2x16xf32, #tpu.memory_space<vmem>>, vector<2x16xf32>,
    %c0_51 = arith.constant 0 : index
    %c0_52 = arith.constant 0 : index
    %131 = vector.load %arg3[%c0_51, %c0_52] : memref<2x5xf32, #tpu.memory_space<vmem>>, vector<2x5xf32>
    tpu.vector_store %arg3[%c0_51, %c0_52], %129 {strides = array<i32>} : memref<2x5xf32, #tpu.memory_space<vmem>>, vector<2x5xf32>,
    return
  }
  func.func @transform_0(%arg0: i32) -> (i32, i32) {
    %c0_i32 = arith.constant 0 : i32
    %c0_i32_0 = arith.constant 0 : i32
    %c0_i32_1 = arith.constant 0 : i32
    return %c0_i32, %c0_i32_0 : i32, i32
  }
  func.func @transform_1(%arg0: i32) -> (i32, i32) {
    %c0_i32 = arith.constant 0 : i32
    %c0_i32_0 = arith.constant 0 : i32
    %c0_i32_1 = arith.constant 0 : i32
    return %c0_i32, %c0_i32_0 : i32, i32
  }
  func.func @transform_2(%arg0: i32) -> (i32, i32) {
    %c0_i32 = arith.constant 0 : i32
    %c0_i32_0 = arith.constant 0 : i32
    %c0_i32_1 = arith.constant 0 : i32
    return %c0_i32, %c0_i32_0 : i32, i32
  }
  func.func @transform_3(%arg0: i32) -> (i32, i32) {
    %c0_i32 = arith.constant 0 : i32
    %c0_i32_0 = arith.constant 0 : i32
    %c0_i32_1 = arith.constant 0 : i32
    return %c0_i32, %c0_i32_0 : i32, i32
  }
}

</mosaic_0001>

<bundles_post_ra>
// kernel: cnn_ln_forward.1
= control target key start
LH: loop header
LB: loop body
LE: loop exit
PB: predicated region body
PF: predicated region fallthrough
CT: control target
= control target key end

     0   :  { %9 = vsyncpa [#allocation3], 0  ;;  %s11869_s0 = inlined_call_operand.vmem [shape: f32[36,72], index: 0, kind: input, shape index: {}]   ;;  %s11870_s1 = inlined_call_operand.hbm [shape: f32[456,256], index: 1, kind: input, shape index: {}]   ;;  %s11871_s2 = inlined_call_operand.hbm [shape: f32[2,5], index: 2, kind: output, shape index: {0}]   ;;  %s11872_s3 = inlined_call_operand.hbm [shape: f32[2,16], index: 3, kind: output, shape index: {1}]  }
   0x1   :  { %10 = vsyncpa [#allocation4], 0 }
   0x2   :  { %11 = vsyncpa [#allocation7], 0  ;;  %s10780_s12 = smov [#allocation2]   ;;  %s10708_s16 = scalar_lea.hbm %s11870_s1, 14592 }
   0x3   :  { %s19_s13 = sshll.u32 %s10780_s12, 4  ;;  %p10709_p0 = scmp.ne.s32.totalorder %s11870_s1, %s10708_s16  ;;  %s20_s13 = int_to_ptr.vmem [resolvable:$true] %s19_s13 }
   0x4   :  { %p10712_p1 = scmp.lt.u32.totalorder %s10708_s16, %s11870_s1 }
   0x6   :  { %p10714_p2 = pnand %p10712_p1, %p10709_p0 }
   0x8   :  { %10717 = shalt.err (!%p10714_p2)
}
   0x9   :  { %s10718_s21 = scalar_lea.vmem %s20_s13, 14592  ;;  %p10723_p4 = scmp.lt.s32.totalorder %s20_s13, %s20_s13 }
   0xa   :  { %p10719_p3 = scmp.ne.s32.totalorder %s20_s13, %s10718_s21  ;;  %p10724_p5 = scmp.lt.s32.totalorder %s10718_s21, %s10718_s21 }
   0xc   :  { %p10725_p6 = por %p10724_p5, %p10723_p4 }
   0xe   :  { %p10726_p7 = pnand %p10725_p6, %p10719_p3 }
  0x10   :  { %10729 = shalt.err (!%p10726_p7)
}
  0x11   :  { %s10781_s22 = smov 256   ;;  %s10782_s23 = smov 16  }
  0x12   :  { %25 = dma.hbm_to_vmem [thread:$0]  %s11870_s1, 14592, %s20_s13, [#allocation3], %s10781_s22, %s10781_s22, %s10782_s23  }
  0x13   :  { %10774 = dma.done.wait [#allocation3], 14592  }
  0x14   :  { %10775 = vsyncadd [#allocation3], 4294952704  ;;  %v10783_v0 = vmov 0.0   ;;  %v35_v1 = vld [vmem:[#allocation2 + $0x8] sm:$0xff]  ;;  %v37_v2 = vld [vmem:[#allocation2 + $0x18] sm:$0xff]  ;;  %vm52_vm0 = vcmask 588800  }
  0x15   :  { %150 = vmatprep.mubr.f32.mxu0 %v10783_v0  ;;  %v34_v3 = vld [vmem:[#allocation2] sm:$0xff]  ;;  %v68_v4 = vand.u32 4294901760, %v35_v1  ;;  %v72_v5 = vand.u32 4294901760, %v37_v2  ;;  %v36_v6 = vld [vmem:[#allocation2 + $0x10] sm:$0xff]  ;;  %v39_v8 = vld [vmem:[#allocation2 + $0x28] sm:$0xff]  ;;  %vm962_vm1 = vcmask 293888  }
  0x16   :  { %v70_v7 = vand.u32 4294901760, %v34_v3  ;;  %v41_v9 = vld [vmem:[#allocation2 + $0x38] sm:$0xff]  ;;  %v74_v10 = vand.u32 4294901760, %v36_v6  ;;  %v76_v11 = vand.u32 4294901760, %v39_v8  ;;  %v38_v13 = vld [vmem:[#allocation2 + $0x20] sm:$0xff]  ;;  %v40_v14 = vld [vmem:[#allocation2 + $0x30] sm:$0xff] }
  0x17   :  { %v80_v12 = vand.u32 4294901760, %v41_v9  ;;  %v43_v15 = vld [vmem:[#allocation2 + $0x48] sm:$0xff]  ;;  %v10824_v16 = vpack.c.bf16 %v72_v5, %v68_v4  ;;  %v10826_v17 = vsub.f32 %v35_v1, %v68_v4  ;;  %v10828_v18 = vsub.f32 %v37_v2, %v72_v5  ;;  %v45_v20 = vld [vmem:[#allocation2 + $0x58] sm:$0xff]  ;;  %v42_v21 = vld [vmem:[#allocation2 + $0x40] sm:$0xff]  ;;  %s10787_s8 = smov 96   ;;  %s10788_s9 = smov 112  }
  0x18   :  { %v10830_v19 = vsub.f32 %v34_v3, %v70_v7  ;;  %v44_v22 = vld [vmem:[#allocation2 + $0x50] sm:$0xff]  ;;  %v10832_v23 = vpack.c.bf16 %v74_v10, %v70_v7  ;;  %v10834_v24 = vsub.f32 %v36_v6, %v74_v10  ;;  %v10838_v26 = vsub.f32 %v39_v8, %v76_v11  ;;  %v47_v27 = vld [vmem:[#allocation2 + $0x68] sm:$0xff]  ;;  %v49_v32 = vld [vmem:[#allocation2 + $0x78] sm:$0xff]  ;;  %s10789_s10 = smov [#allocation6]  }
  0x19   :  { %v10836_v25 = vpack.c.bf16 %v80_v12, %v76_v11  ;;  %9932 = vmatprep.subr.bf16.mxu0 %v10824_v16  ;;  %v10841_v28 = vsub.f32 %v41_v9, %v80_v12  ;;  %v78_v29 = vand.u32 4294901760, %v38_v13  ;;  %v82_v30 = vand.u32 4294901760, %v40_v14  ;;  %v46_v37 = vld [vmem:[#allocation2 + $0x60] sm:$0xff]  ;;  %v48_v38 = vld [vmem:[#allocation2 + $0x70] sm:$0xff]  ;;  %v10853_v43 = vld [vmem:[#allocation2 + $0x88] sm:$0xff]  ;;  %s8580_s11 = sshll.u32 %s10789_s10, 4  ;;  %s8581_s11 = int_to_ptr.vmem [resolvable:$true] %s8580_s11 }
  0x1a   :  { %v84_v31 = vand.u32 4294901760, %v43_v15  ;;  %9934 = vmatpush1.bf16.msra.mxu0 %v10832_v23  ;;  %v88_v33 = vand.u32 4294901760, %v45_v20  ;;  %v86_v34 = vand.u32 4294901760, %v42_v21  ;;  %v90_v35 = vand.u32 4294901760, %v44_v22  ;;  %v50_v44 = vld [vmem:[#allocation2 + $0x80] sm:$0xff]  ;;  %v30_v62 = vld [vmem:[%s11869_s0 + $0x8] sm:$0xff]  ;;  %p10735_p9 = scmp.lt.s32.totalorder %s8581_s11, %s8581_s11 }
  0x1b   :  { %v92_v36 = vand.u32 4294901760, %v47_v27  ;;  %9936 = vmatprep.subr.bf16.mxu0 %v10836_v25  ;;  %v10845_v39 = vpack.c.bf16 %v82_v30, %v78_v29  ;;  %v10847_v40 = vsub.f32 %v38_v13, %v78_v29  ;;  %v10849_v41 = vsub.f32 %v40_v14, %v82_v30  ;;  %v29_v45 = vld [vmem:[%s11869_s0] sm:$0xff]  ;;  %s10730_s12 = scalar_lea.vmem %s8581_s11, 32 }
  0x1c   :  { %v10851_v42 = vsub.f32 %v43_v15, %v84_v31  ;;  %v10858_v46 = vpack.c.bf16 %v88_v33, %v84_v31  ;;  %v10860_v47 = vsub.f32 %v45_v20, %v88_v33  ;;  %v10862_v48 = vpack.c.bf16 %v90_v35, %v86_v34  ;;  %v31_v33 = vld [vmem:[%s11869_s0 + $0x10] sm:$0xff]  ;;  %p10731_p8 = scmp.ne.s32.totalorder %s8581_s11, %s10730_s12  ;;  %p10736_p10 = scmp.lt.s32.totalorder %s10730_s12, %s10730_s12 }
  0x1d   :  { %v10864_v49 = vsub.f32 %v42_v21, %v86_v34  ;;  %v10866_v50 = vsub.f32 %v44_v22, %v90_v35  ;;  %v96_v51 = vand.u32 4294901760, %v49_v32  ;;  %v10868_v52 = vsub.f32 %v47_v27, %v92_v36 }
  0x1e   :  { %v94_v53 = vand.u32 4294901760, %v46_v37  ;;  %9938 = vmatpush1.bf16.msra.mxu0 %v10845_v39  ;;  %v98_v54 = vand.u32 4294901760, %v48_v38  ;;  %v10872_v55 = vand.u32 4294901760, %v10853_v43  ;;  %v10874_v56 = vand.u32 4294901760, %v50_v44  ;;  %p10737_p11 = por %p10736_p10, %p10735_p9 }
  0x1f   :  { %v54_v57 = vsel %vm52_vm0, %v29_v45, 0  ;;  %9940 = vmatprep.subr.bf16.mxu0 %v10858_v46  ;;  %v10878_v58 = vpack.c.bf16 %v96_v51, %v92_v36  ;;  %v10880_v59 = vsub.f32 %v49_v32, %v96_v51  ;;  %v208_v3 = vand.u32 4294901760, %v10826_v17 }
  0x20   :  { %v10882_v60 = vsub.f32 %v46_v37, %v94_v53  ;;  %v10884_v61 = vand.u32 4294901760, %v54_v57  ;;  %v10889_v63 = vpack.c.bf16 %v98_v54, %v94_v53  ;;  %v10891_v1 = vsub.f32 %v48_v38, %v98_v54  ;;  %p10738_p12 = pnand %p10737_p11, %p10731_p8 }
  0x21   :  { %v10894_v2 = vsub.f32 %v50_v44, %v10874_v56  ;;  %v220_v5 = vand.u32 4294901760, %v10828_v18  ;;  %v214_v6 = vand.u32 4294901760, %v10830_v19  ;;  %v226_v7 = vand.u32 4294901760, %v10834_v24 }
  0x22   :  { %v10898_v4 = vsub.f32 %v54_v57, %v10884_v61  ;;  %9942 = vmatpush1.bf16.msra.mxu0 %v10862_v48  ;;  %v209_v8 = vsub.f32 %v10826_v17, %v208_v3  ;;  %v57_v9 = vsel %vm52_vm0, %v30_v62, 0  ;;  %v232_v10 = vand.u32 4294901760, %v10838_v26 }
  0x23   :  { %v11882_v11 = vand.u32 4294901760, %v10841_v28  ;;  %9944 = vmatprep.subr.bf16.mxu0 %v10878_v58  ;;  %v221_v13 = vsub.f32 %v10828_v18, %v220_v5  ;;  %v215_v14 = vsub.f32 %v10830_v19, %v214_v6  ;;  %v227_v15 = vsub.f32 %v10834_v24, %v226_v7 }
  0x24   :  { %v11874_v12 = vand.u32 4294901760, %v10898_v4  ;;  %v210_v20 = vand.u32 4294901760, %v209_v8  ;;  %v10921_v21 = vand.u32 4294901760, %v57_v9  ;;  %v233_v22 = vsub.f32 %v10838_v26, %v232_v10 }
  0x25   :  { %v245_v27 = vsub.f32 %v10841_v28, %v11882_v11  ;;  %v222_v30 = vand.u32 4294901760, %v221_v13  ;;  %v216_v31 = vand.u32 4294901760, %v215_v14  ;;  %v228_v32 = vand.u32 4294901760, %v227_v15  ;;  %v32_v15 = vld [vmem:[%s11869_s0 + $0x18] sm:$0xff] }
  0x26   :  { %v154_v29 = vsub.f32 %v10898_v4, %v11874_v12  ;;  %9946 = vmatpush1.bf16.msra.mxu0 %v10889_v63  ;;  %v10937_v34 = vsub.f32 %v57_v9, %v10921_v21  ;;  %v234_v35 = vand.u32 4294901760, %v233_v22  ;;  %v11881_v37 = vand.u32 4294901760, %v10847_v40 }
  0x27   :  { %v246_v36 = vand.u32 4294901760, %v245_v27  ;;  %101 = vmatprep.subr.mxu0 %v10872_v55  ;;  %v9947_v44 = vpack.c.bf16 %v222_v30, %v210_v20  ;;  %v9949_v45 = vpack.c.bf16 %v228_v32, %v216_v31  ;;  %v11880_v51 = vand.u32 4294901760, %v10849_v41 }
  0x28   :  { %v155_v38 = vand.u32 4294901760, %v154_v29  ;;  %v11873_v53 = vand.u32 4294901760, %v10937_v34  ;;  %v239_v57 = vsub.f32 %v10847_v40, %v11881_v37  ;;  %v60_v62 = vsel %vm52_vm0, %v31_v33, 0 }
  0x29   :  { %v9951_v54 = vpack.c.bf16 %v246_v36, %v234_v35  ;;  %v251_v8 = vsub.f32 %v10849_v41, %v11880_v51  ;;  %v10950_v9 = vand.u32 4294901760, %v60_v62  ;;  %v11879_v13 = vand.u32 4294901760, %v10851_v42 }
  0x2a   :  { %v11875_v14 = vand.u32 4294901760, %v10860_v47  ;;  %103 = vmatpush1.msra.mxu0 %v10874_v56  ;;  %v165_v20 = vsub.f32 %v10937_v34, %v11873_v53  ;;  %v240_v22 = vand.u32 4294901760, %v239_v57  ;;  %v11876_v27 = vand.u32 4294901760, %v10864_v49 }
  0x2b   :  { %v11878_v29 = vand.u32 4294901760, %v10866_v50  ;;  %156 = vmatmul.mubr.f32.vlgmr.msra.gmra.mrb[0].mxu0 %v155_v38  ;;  %9948 = vmatprep.subr.bf16.mxu0 %v9947_v44  ;;  %v252_v30 = vand.u32 4294901760, %v251_v8  ;;  %v10964_v31 = vsub.f32 %v60_v62, %v10950_v9  ;;  %v257_v32 = vsub.f32 %v10851_v42, %v11879_v13 }
  0x2c   :  { %v269_v33 = vsub.f32 %v10860_v47, %v11875_v14  ;;  %161 = vmatprep.mubr.f32.mxu0 %v10783_v0  ;;  %9950 = vmatpush1.bf16.msra.mxu0 %v9949_v45  ;;  %v166_v35 = vand.u32 4294901760, %v165_v20  ;;  %v263_v36 = vsub.f32 %v10864_v49, %v11876_v27  ;;  %v63_v44 = vsel %vm52_vm0, %v32_v15, 0  ;;  %v33_v27 = vld [vmem:[%s11869_s0 + $0x20] sm:$0xf]  ;;  %s10784_s0 = smov 64  }
  0x2d   :  { %v275_v38 = vsub.f32 %v10866_v50, %v11878_v29  ;;  %9952 = vmatprep.subr.bf16.mxu0 %v9951_v54  ;;  %v9953_v57 = vpack.c.bf16 %v252_v30, %v240_v22  ;;  %v11877_v62 = vand.u32 4294901760, %v10964_v31  ;;  %v258_v8 = vand.u32 4294901760, %v257_v32 }
  0x2e   :  { %v270_v53 = vand.u32 4294901760, %v269_v33  ;;  %v264_v12 = vand.u32 4294901760, %v263_v36  ;;  %v10981_v45 = vand.u32 4294901760, %v63_v44  ;;  %v280_v20 = vand.u32 4294901760, %v10868_v52 }
  0x2f   :  { %v276_v14 = vand.u32 4294901760, %v275_v38  ;;  %167 = vmatmul.mubr.f32.gmra.mrb[2].mxu0 %v166_v35  ;;  %v176_v54 = vsub.f32 %v10964_v31, %v11877_v62  ;;  %v292_v22 = vand.u32 4294901760, %v10880_v59  ;;  %v286_v30 = vand.u32 4294901760, %v10882_v60 }
  0x30   :  { %v9955_v15 = vpack.c.bf16 %v270_v53, %v258_v8  ;;  %172 = vmatprep.mubr.f32.mxu0 %v10783_v0  ;;  %9954 = vmatpush1.bf16.msra.mxu0 %v9953_v57  ;;  %v10994_v33 = vsub.f32 %v63_v44, %v10981_v45  ;;  %v281_v36 = vsub.f32 %v10868_v52, %v280_v20  ;;  %v298_v35 = vand.u32 4294901760, %v10891_v1 }
  0x31   :  { %v9957_v32 = vpack.c.bf16 %v276_v14, %v264_v12  ;;  %v177_v38 = vand.u32 4294901760, %v176_v54  ;;  %v293_v62 = vsub.f32 %v10880_v59, %v292_v22  ;;  %v287_v53 = vsub.f32 %v10882_v60, %v286_v30 }
  0x32   :  { %9956 = vmatprep.subr.bf16.mxu0 %v9955_v15  ;;  %v66_v8 = vsel %vm52_vm0, %v33_v27, 0  ;;  %v186_v29 = vand.u32 4294901760, %v10994_v33  ;;  %v282_v13 = vand.u32 4294901760, %v281_v36  ;;  %v299_v12 = vsub.f32 %v10891_v1, %v298_v35 }
  0x33   :  { %v11003_v14 = vand.u32 4294901760, %v66_v8  ;;  %178 = vmatmul.mubr.f32.gmra.mrb[4].mxu0 %v177_v38  ;;  %v294_v44 = vand.u32 4294901760, %v293_v62  ;;  %v288_v57 = vand.u32 4294901760, %v287_v53  ;;  %v11007_v54 = vsub.f32 %v10853_v43, %v10872_v55 }
  0x34   :  { %v11883_v15 = vand.u32 4294901760, %v10894_v2  ;;  %183 = vmatprep.mubr.f32.mxu0 %v10783_v0  ;;  %9958 = vmatpush1.bf16.msra.mxu0 %v9957_v32  ;;  %v187_v27 = vsub.f32 %v10994_v33, %v186_v29  ;;  %v300_v36 = vand.u32 4294901760, %v299_v12  ;;  %v9963_v12 = vpack.c.bf16 %v10828_v18, %v10826_v17 }
  0x35   :  { %v11015_v51 = vsub.f32 %v66_v8, %v11003_v14  ;;  %v9959_v38 = vpack.c.bf16 %v294_v44, %v282_v13  ;;  %v304_v62 = vand.u32 4294901760, %v11007_v54  ;;  %v11887_v17 = vand.u32 4294901760, %v10851_v42 }
  0x36   :  { %v311_v43 = vsub.f32 %v10894_v2, %v11883_v15  ;;  %v188_v53 = vand.u32 4294901760, %v187_v27  ;;  %v9961_v37 = vpack.c.bf16 %v300_v36, %v288_v57  ;;  %v9995_v57 = vpack.c.bf16 %v220_v5, %v208_v3 }
  0x37   :  { %v197_v11 = vand.u32 4294901760, %v11015_v51  ;;  %9960 = vmatprep.subr.bf16.mxu0 %v9959_v38  ;;  %v305_v32 = vsub.f32 %v11007_v54, %v304_v62  ;;  %v9997_v27 = vpack.c.bf16 %v226_v7, %v214_v6  ;;  %v11884_v36 = vand.u32 4294901760, %v10841_v28 }
  0x38   :  { %189 = vmatmul.mubr.f32.gmra.mrb[6].mxu0 %v188_v53  ;;  %v312_v8 = vand.u32 4294901760, %v311_v43  ;;  %v11885_v53 = vand.u32 4294901760, %v10847_v40  ;;  %v11888_v18 = vand.u32 4294901760, %v10860_v47  ;;  %v11889_v5 = vand.u32 4294901760, %v10864_v49 }
  0x39   :  { %v198_v13 = vsub.f32 %v11015_v51, %v197_v11  ;;  %194 = vmatprep.mubr.f32.mxu0 %v10783_v0  ;;  %9962 = vmatpush1.bf16.msra.mxu0 %v9961_v37  ;;  %v306_v44 = vand.u32 4294901760, %v305_v32  ;;  %v9999_v38 = vpack.c.bf16 %v11884_v36, %v232_v10  ;;  %v11886_v37 = vand.u32 4294901760, %v10849_v41 }
  0x3a   :  { %v10003_v3 = vpack.c.bf16 %v11888_v18, %v11887_v17  ;;  %v11890_v6 = vand.u32 4294901760, %v10866_v50  ;;  %v11057_v15 = vpack.c.bf16 %v292_v22, %v280_v20  ;;  %v11059_v10 = vpack.c.bf16 %v298_v35, %v286_v30 }
  0x3b   :  { %v199_v43 = vand.u32 4294901760, %v198_v13  ;;  %v10001_v32 = vpack.c.bf16 %v11886_v37, %v11885_v53  ;;  %307 = vmatprep.subr.mxu0 %v306_v44  ;;  %v9965_v13 = vpack.c.bf16 %v10834_v24, %v10830_v19  ;;  %v9967_v36 = vpack.c.bf16 %v10841_v28, %v10838_v26 }
  0x3c   :  { %v11055_v7 = vpack.c.bf16 %v11890_v6, %v11889_v5  ;;  %v9969_v20 = vpack.c.bf16 %v10849_v41, %v10847_v40  ;;  %v9971_v22 = vpack.c.bf16 %v10860_v47, %v10851_v42  ;;  %v9973_v19 = vpack.c.bf16 %v10866_v50, %v10864_v49 }
  0x3d   :  { %200 = vmatmul.mubr.f32.gmra.mrb[8].mxu0 %v199_v43  ;;  %v9975_v24 = vpack.c.bf16 %v10880_v59, %v10868_v52  ;;  %v9977_v26 = vpack.c.bf16 %v10891_v1, %v10882_v60  ;;  %v11891_v28 = vand.u32 4294901760, %v10898_v4  ;;  %v11892_v40 = vand.u32 4294901760, %v10937_v34 }
  0x3e   :  { %313 = vmatpush1.msra.mxu0 %v312_v8  ;;  %360 = vmatprep.mubr.f32.mxu0 %v10783_v0  ;;  %v11893_v41 = vand.u32 4294901760, %v10964_v31  ;;  %v11894_v42 = vand.u32 4294901760, %v10894_v2  ;;  %vm969_vm2 = vcmask 1043456   ;;  %vm10786_vm3 = vmmov 0  }
  0x3f   :  { %9964 = vmatprep.subr.bf16.mxu0 %v9963_v12  ;;  %vm2614_vm4 = vcmask 523264   ;;  %vm2635_vm5 = vcmask 1040384   ;;  %vm3219_vm6 = vcmask 130048   ;;  %vm4286_vm7 = vcmask 261120  }
  0x40   :  { %vm4783_vm8 = vcmask 64512   ;;  %vm6133_vm9 = vcmask 257024   ;;  %vm6672_vm10 = vcmask 31744   ;;  %vm8560_vm11 = vcmask 123904  }
  0x41   :  { %362 = vmatmul.mubr.f32.vlgmr.msra.gmra.mrb[0].mxu0 %v10884_v61 }
  0x42   :  { %367 = vmatprep.mubr.f32.mxu0 %v10783_v0  ;;  %9966 = vmatpush1.bf16.msra.mxu0 %v9965_v13 }
  0x43   :  { %9968 = vmatprep.subr.bf16.mxu0 %v9967_v36 }
  0x45   :  { %369 = vmatmul.mubr.f32.gmra.mrb[2].mxu0 %v10921_v21 }
  0x46   :  { %374 = vmatprep.mubr.f32.mxu0 %v10783_v0  ;;  %9970 = vmatpush1.bf16.msra.mxu0 %v9969_v20 }
  0x47   :  { %9972 = vmatprep.subr.bf16.mxu0 %v9971_v22 }
  0x49   :  { %376 = vmatmul.mubr.f32.gmra.mrb[4].mxu0 %v10950_v9 }
  0x4a   :  { %381 = vmatprep.mubr.f32.mxu0 %v10783_v0  ;;  %9974 = vmatpush1.bf16.msra.mxu0 %v9973_v19 }
  0x4b   :  { %9976 = vmatprep.subr.bf16.mxu0 %v9975_v24 }
  0x4d   :  { %383 = vmatmul.mubr.f32.gmra.mrb[6].mxu0 %v10981_v45 }
  0x4e   :  { %388 = vmatprep.mubr.f32.mxu0 %v10783_v0  ;;  %9978 = vmatpush1.bf16.msra.mxu0 %v9977_v26 }
  0x4f   :  { %446 = vmatprep.subr.mxu0 %v11007_v54 }
  0x51   :  { %390 = vmatmul.mubr.f32.gmra.mrb[8].mxu0 %v11003_v14 }
  0x52   :  { %449 = vmatpush1.msra.mxu0 %v10894_v2  ;;  %496 = vmatprep.mubr.f32.mxu0 %v10783_v0 }
  0x53   :  { %9980 = vmatprep.subr.bf16.mxu0 %v10824_v16 }
  0x55   :  { %499 = vmatmul.mubr.f32.vlgmr.msra.gmra.mrb[0].mxu0 %v10898_v4 }
  0x56   :  { %504 = vmatprep.mubr.f32.mxu0 %v10783_v0  ;;  %9982 = vmatpush1.bf16.msra.mxu0 %v10832_v23 }
  0x57   :  { %9984 = vmatprep.subr.bf16.mxu0 %v10836_v25 }
  0x59   :  { %507 = vmatmul.mubr.f32.gmra.mrb[2].mxu0 %v10937_v34 }
  0x5a   :  { %512 = vmatprep.mubr.f32.mxu0 %v10783_v0  ;;  %9986 = vmatpush1.bf16.msra.mxu0 %v10845_v39 }
  0x5b   :  { %9988 = vmatprep.subr.bf16.mxu0 %v10858_v46 }
  0x5d   :  { %515 = vmatmul.mubr.f32.gmra.mrb[4].mxu0 %v10964_v31 }
  0x5e   :  { %520 = vmatprep.mubr.f32.mxu0 %v10783_v0  ;;  %9990 = vmatpush1.bf16.msra.mxu0 %v10862_v48 }
  0x5f   :  { %9992 = vmatprep.subr.bf16.mxu0 %v10878_v58 }
  0x61   :  { %523 = vmatmul.mubr.f32.gmra.mrb[6].mxu0 %v10994_v33 }
  0x62   :  { %528 = vmatprep.mubr.f32.mxu0 %v10783_v0  ;;  %9994 = vmatpush1.bf16.msra.mxu0 %v10889_v63 }
  0x63   :  { %570 = vmatprep.subr.mxu0 %v10872_v55 }
  0x65   :  { %531 = vmatmul.mubr.f32.gmra.mrb[8].mxu0 %v11015_v51 }
  0x66   :  { %572 = vmatpush1.msra.mxu0 %v10874_v56  ;;  %619 = vmatprep.mubr.f32.mxu0 %v10783_v0 }
  0x67   :  { %9996 = vmatprep.subr.bf16.mxu0 %v9995_v57 }
  0x69   :  { %623 = vmatmul.mubr.f32.vlgmr.msra.gmra.mrb[0].mxu0 %v11891_v28 }
  0x6a   :  { %628 = vmatprep.mubr.f32.mxu0 %v10783_v0  ;;  %9998 = vmatpush1.bf16.msra.mxu0 %v9997_v27 }
  0x6b   :  { %10000 = vmatprep.subr.bf16.mxu0 %v9999_v38 }
  0x6d   :  { %632 = vmatmul.mubr.f32.gmra.mrb[2].mxu0 %v11892_v40 }
  0x6e   :  { %637 = vmatprep.mubr.f32.mxu0 %v10783_v0  ;;  %10002 = vmatpush1.bf16.msra.mxu0 %v10001_v32 }
  0x6f   :  { %10004 = vmatprep.subr.bf16.mxu0 %v10003_v3 }
  0x71   :  { %641 = vmatmul.mubr.f32.gmra.mrb[4].mxu0 %v11893_v41 }
  0x72   :  { %646 = vmatprep.mubr.f32.mxu0 %v10783_v0  ;;  %10006 = vmatpush1.bf16.msra.mxu0 %v11055_v7 }
  0x73   :  { %10008 = vmatprep.subr.bf16.mxu0 %v11057_v15 }
  0x75   :  { %650 = vmatmul.mubr.f32.gmra.mrb[6].mxu0 %v186_v29 }
  0x76   :  { %655 = vmatprep.mubr.f32.mxu0 %v10783_v0  ;;  %10010 = vmatpush1.bf16.msra.mxu0 %v11059_v10 }
  0x77   :  { %732 = vmatprep.subr.mxu0 %v304_v62 }
  0x79   :  { %659 = vmatmul.mubr.f32.gmra.mrb[8].mxu0 %v197_v11 }
  0x7a   :  { %736 = vmatpush1.msra.mxu0 %v11894_v42  ;;  %783 = vmatprep.mubr.f32.mxu0 %v10783_v0 }
  0x7b   :  { %10012 = vmatprep.subr.bf16.mxu0 %v10824_v16  ;;  %v939_v16 = vld [vmem:[#allocation2 + $0xb0] sm:$0xff] }
  0x7d   :  { %785 = vmatmul.mubr.f32.vlgmr.msra.gmra.mrb[0].mxu0 %v10884_v61 }
  0x7e   :  { %790 = vmatprep.mubr.f32.mxu0 %v10783_v0  ;;  %10014 = vmatpush1.bf16.msra.mxu0 %v10832_v23  ;;  %v964_v23 = vsel %vm962_vm1, %v939_v16, 0 }
  0x7f   :  { %10016 = vmatprep.subr.bf16.mxu0 %v10836_v25 }
  0x81   :  { %792 = vmatmul.mubr.f32.gmra.mrb[2].mxu0 %v10921_v21 }
  0x82   :  { %797 = vmatprep.mubr.f32.mxu0 %v10783_v0  ;;  %10018 = vmatpush1.bf16.msra.mxu0 %v10845_v39  ;;  %v11160_v39 = vand.u32 4294901760, %v964_v23 }
  0x83   :  { %10020 = vmatprep.subr.bf16.mxu0 %v10858_v46 }
  0x84   :  { %v11164_v49 = vsub.f32 %v964_v23, %v11160_v39 }
  0x85   :  { %799 = vmatmul.mubr.f32.gmra.mrb[4].mxu0 %v10950_v9 }
  0x86   :  { %804 = vmatprep.mubr.f32.mxu0 %v10783_v0  ;;  %10022 = vmatpush1.bf16.msra.mxu0 %v10862_v48 }
  0x87   :  { %10024 = vmatprep.subr.bf16.mxu0 %v10878_v58 }
  0x89   :  { %806 = vmatmul.mubr.f32.gmra.mrb[6].mxu0 %v10981_v45 }
  0x8a   :  { %811 = vmatprep.mubr.f32.mxu0 %v10783_v0  ;;  %10026 = vmatpush1.bf16.msra.mxu0 %v10889_v63 }
  0x8b   :  { %852 = vmatprep.subr.mxu0 %v10872_v55 }
  0x8d   :  { %813 = vmatmul.mubr.f32.gmra.mrb[8].mxu0 %v11003_v14 }
  0x8e   :  { %854 = vmatpush1.msra.mxu0 %v10874_v56  ;;  %901 = vmatprep.mubr.f32.mxu0 %v10783_v0  ;;  %v1044_v56 = vand.u32 4294901760, %v11164_v49 }
  0x90   :  { %v1045_v1 = vsub.f32 %v11164_v49, %v1044_v56 }
  0x91   :  { %903 = vmatmul.mubr.f32.vlgmr.msra.gmra.mrb[0].mxu0 %v10884_v61 }
  0x92   :  { %908 = vmatprep.mubr.f32.mxu0 %v10783_v0  ;;  %v1046_v51 = vand.u32 4294901760, %v1045_v1 }
  0x94   :  { %9035 = vmatprep.mubr.f32.mxu1 %v1046_v51 }
  0x95   :  { %910 = vmatmul.mubr.f32.gmra.mrb[2].mxu0 %v10921_v21 }
  0x96   :  { %915 = vmatprep.mubr.f32.mxu0 %v10783_v0 }
  0x99   :  { %917 = vmatmul.mubr.f32.gmra.mrb[4].mxu0 %v10950_v9 }
  0x9a   :  { %922 = vmatprep.mubr.f32.mxu0 %v10783_v0 }
  0x9d   :  { %924 = vmatmul.mubr.f32.gmra.mrb[6].mxu0 %v10981_v45 }
  0x9e   :  { %929 = vmatprep.mubr.f32.mxu0 %v10783_v0 }
  0xa1   :  { %931 = vmatmul.mubr.f32.gmra.mrb[8].mxu0 %v11003_v14 }
  0xa2   :  { %9275 = vmatprep.mubr.msk.f32.mxu0 %vm10786_vm3, %v10783_v0 }
 0x164   :  { %v904_v25 = vpop.f32.mrb[0].mxu0 }
 0x165   :  { %v1522_v46 = vand.u32 4294901760, %v904_v25  ;;  %948 = vrot.lane.b32.xlu0 %v904_v25, %s10784_s0  ;;  %v906_v47 = vpop.f32.mrb[1].mxu0 }
 0x166   :  { %v2072_v48 = vand.u32 4294901760, %v906_v47 }
 0x167   :  { %v1613_v50 = vsub.f32 %v904_v25, %v1522_v46 }
 0x168   :  { %v2163_v52 = vsub.f32 %v906_v47, %v2072_v48  ;;  %v911_v55 = vpop.f32.mrb[2].mxu0 }
 0x169   :  { %v1614_v58 = vand.u32 4294901760, %v1613_v50  ;;  %v1525_v59 = vand.u32 4294901760, %v911_v55  ;;  %950 = vrot.lane.b32.xlu0 %v911_v55, %s10784_s0  ;;  %v913_v60 = vpop.f32.mrb[3].mxu0 }
 0x16a   :  { %v2164_v61 = vand.u32 4294901760, %v2163_v52  ;;  %v2075_v63 = vand.u32 4294901760, %v913_v60 }
 0x16b   :  { %v11171_v2 = vpack.c.bf16 %v1525_v59, %v1522_v46  ;;  %v1620_v4 = vsub.f32 %v911_v55, %v1525_v59  ;;  %v1615_v45 = vsub.f32 %v1613_v50, %v1614_v58  ;;  %v940_v59 = vld [vmem:[#allocation2 + $0xc0] sm:$0xff] }
 0x16c   :  { %v11173_v11 = vpack.c.bf16 %v2075_v63, %v2072_v48  ;;  %v2170_v21 = vsub.f32 %v913_v60, %v2075_v63  ;;  %v918_v34 = vpop.f32.mrb[4].mxu0  ;;  %v2165_v30 = vsub.f32 %v2163_v52, %v2164_v61 }
 0x16d   :  { %v1621_v9 = vand.u32 4294901760, %v1620_v4  ;;  %v1528_v29 = vand.u32 4294901760, %v918_v34  ;;  %952 = vrot.lane.b32.xlu1 %v918_v34, %s10784_s0  ;;  %v920_v31 = vpop.f32.mrb[5].mxu0  ;;  %v11176_v14 = vpack.c.bf16 %v1620_v4, %v1613_v50  ;;  %v1616_v37 = vand.u32 4294901760, %v1615_v45 }
 0x16e   :  { %v2171_v33 = vand.u32 4294901760, %v2170_v21  ;;  %v2078_v35 = vand.u32 4294901760, %v920_v31  ;;  %v11180_v8 = vpack.c.bf16 %v2170_v21, %v2163_v52  ;;  %v2166_v3 = vand.u32 4294901760, %v2165_v30 }
 0x16f   :  { %v1627_v54 = vsub.f32 %v918_v34, %v1528_v29  ;;  %v1622_v15 = vsub.f32 %v1620_v4, %v1621_v9  ;;  %v11178_v62 = vpack.c.bf16 %v1621_v9, %v1614_v58 }
 0x170   :  { %v2172_v12 = vsub.f32 %v2170_v21, %v2171_v33  ;;  %v2177_v44 = vsub.f32 %v920_v31, %v2078_v35  ;;  %v925_v57 = vpop.f32.mrb[6].mxu0  ;;  %v11182_v27 = vpack.c.bf16 %v2171_v33, %v2164_v61  ;;  %v967_v61 = vsel %vm962_vm1, %v940_v59, 0 }
 0x171   :  { %v1628_v38 = vand.u32 4294901760, %v1627_v54  ;;  %v1531_v43 = vand.u32 4294901760, %v925_v57  ;;  %954 = vrot.lane.b32.xlu1 %v925_v57, %s10784_s0  ;;  %v927_v53 = vpop.f32.mrb[7].mxu0  ;;  %v1623_v32 = vand.u32 4294901760, %v1622_v15  ;;  %v11212_v1 = vand.u32 4294901760, %v967_v61 }
 0x172   :  { %v2178_v17 = vand.u32 4294901760, %v2177_v44  ;;  %v2081_v18 = vand.u32 4294901760, %v927_v53  ;;  %v2173_v5 = vand.u32 4294901760, %v2172_v12 }
 0x173   :  { %v11185_v6 = vpack.c.bf16 %v1531_v43, %v1528_v29  ;;  %v1634_v7 = vsub.f32 %v925_v57, %v1531_v43  ;;  %v11187_v10 = vpack.c.bf16 %v1623_v32, %v1616_v37  ;;  %v1629_v26 = vsub.f32 %v1627_v54, %v1628_v38 }
 0x174   :  { %v11189_v13 = vpack.c.bf16 %v2081_v18, %v2078_v35  ;;  %v2184_v36 = vsub.f32 %v927_v53, %v2081_v18  ;;  %v11191_v20 = vpop.f32.mrb[8].mxu0  ;;  %v11193_v22 = vpack.c.bf16 %v2173_v5, %v2166_v3  ;;  %v2179_v40 = vsub.f32 %v2177_v44, %v2178_v17 }
 0x175   :  { %v1635_v19 = vand.u32 4294901760, %v1634_v7  ;;  %956 = vrot.lane.b32.xlu0 %v11191_v20, %s10784_s0  ;;  %v11197_v24 = vpop.f32.mrb[9].mxu0  ;;  %v11199_v28 = vpack.c.bf16 %v1634_v7, %v1627_v54  ;;  %v1630_v47 = vand.u32 4294901760, %v1629_v26  ;;  %v11221_v29 = vsub.f32 %v967_v61, %v11212_v1  ;;  %v937_v61 = vld [vmem:[#allocation2 + $0x90] sm:$0xff] }
 0x176   :  { %v2185_v41 = vand.u32 4294901760, %v2184_v36  ;;  %v11203_v23 = vpack.c.bf16 %v2184_v36, %v2177_v44  ;;  %v2180_v50 = vand.u32 4294901760, %v2179_v40 }
 0x177   :  { %v1636_v42 = vsub.f32 %v1634_v7, %v1635_v19  ;;  %v11201_v16 = vpack.c.bf16 %v1635_v19, %v1628_v38  ;;  %v1054_v54 = vand.u32 4294901760, %v11221_v29 }
 0x178   :  { %v2186_v25 = vsub.f32 %v2184_v36, %v2185_v41  ;;  %v11205_v46 = vpack.c.bf16 %v2185_v41, %v2178_v17 }
 0x179   :  { %v1637_v48 = vand.u32 4294901760, %v1636_v42  ;;  %v1055_v37 = vsub.f32 %v11221_v29, %v1054_v54 }
 0x17a   :  { %v2187_v52 = vand.u32 4294901760, %v2186_v25 }
 0x17b   :  { %v11207_v55 = vpack.c.bf16 %v1637_v48, %v1630_v47  ;;  %v1056_v26 = vand.u32 4294901760, %v1055_v37  ;;  %v2069_v37 = vsel %vm969_vm2, %v11197_v24, 0 }
 0x17c   :  { %v11209_v58 = vpack.c.bf16 %v2187_v52, %v2180_v50 }
 0x1d7   :  { %v949_v60 = vpop.permute.xlu0 %948 }
 0x1d8   :  { %v973_v63 = vand.u32 4294901760, %v949_v60 }
 0x1da   :  { %v11214_v34 = vsub.f32 %v949_v60, %v973_v63 }
 0x1db   :  { %v951_v4 = vpop.permute.xlu0 %950 }
 0x1dc   :  { %v976_v21 = vand.u32 4294901760, %v951_v4  ;;  %v1065_v33 = vand.u32 4294901760, %v11214_v34 }
 0x1de   :  { %v11216_v51 = vpack.c.bf16 %v976_v21, %v973_v63  ;;  %v11218_v9 = vsub.f32 %v951_v4, %v976_v21  ;;  %v1066_v38 = vsub.f32 %v11214_v34, %v1065_v33  ;;  %v1514_v4 = vsel %vm962_vm1, %v937_v61, 0 }
 0x1df   :  { %v953_v31 = vpop.permute.xlu1 %952 }
 0x1e0   :  { %v1072_v45 = vand.u32 4294901760, %v11218_v9  ;;  %v979_v30 = vand.u32 4294901760, %v953_v31  ;;  %10028 = vmatprep.subr.bf16.mxu1 %v11216_v51  ;;  %v1067_v19 = vand.u32 4294901760, %v1066_v38  ;;  %v10043_v59 = vpack.c.bf16 %v11218_v9, %v11214_v34 }
 0x1e1   :  { %10030 = vmatpush3.bf16.msra.mxu1 %v11216_v51 }
 0x1e2   :  { %v11227_v35 = vsub.f32 %v953_v31, %v979_v30  ;;  %v1073_v12 = vsub.f32 %v11218_v9, %v1072_v45  ;;  %v10059_v63 = vpack.c.bf16 %v1072_v45, %v1065_v33  ;;  %v1519_v33 = vsel %vm969_vm2, %v11191_v20, 0 }
 0x1e3   :  { %v955_v15 = vpop.permute.xlu1 %954 }
 0x1e4   :  { %v1079_v44 = vand.u32 4294901760, %v11227_v35  ;;  %v982_v57 = vand.u32 4294901760, %v955_v15  ;;  %v1074_v5 = vand.u32 4294901760, %v1073_v12 }
 0x1e6   :  { %v11235_v43 = vpack.c.bf16 %v982_v57, %v979_v30  ;;  %v1085_v53 = vsub.f32 %v955_v15, %v982_v57  ;;  %v1080_v17 = vsub.f32 %v11227_v35, %v1079_v44  ;;  %v10035_v41 = vpack.c.bf16 %v1074_v5, %v1067_v19 }
 0x1e7   :  { %v957_v32 = vpop.permute.xlu0 %956 }
 0x1e8   :  { %v1086_v18 = vand.u32 4294901760, %v1085_v53  ;;  %v970_v3 = vsel %vm969_vm2, %v957_v32, 0  ;;  %10032 = vmatprep.subr.bf16.mxu1 %v11235_v43  ;;  %v1081_v42 = vand.u32 4294901760, %v1080_v17  ;;  %v10047_v60 = vpack.c.bf16 %v1085_v53, %v11227_v35 }
 0x1e9   :  { %v11241_v7 = vand.u32 4294901760, %v970_v3  ;;  %10034 = vmatpush3.bf16.msra.mxu1 %v11235_v43  ;;  %v2084_v17 = vand.u32 4294901760, %v2069_v37 }
 0x1ea   :  { %v1087_v36 = vsub.f32 %v1085_v53, %v1086_v18  ;;  %v10063_v21 = vpack.c.bf16 %v1086_v18, %v1079_v44 }
 0x1eb   :  { %v1092_v40 = vsub.f32 %v970_v3, %v11241_v7  ;;  %9033 = vmatprep.subr.mxu1 %v11241_v7 }
 0x1ec   :  { %v1088_v25 = vand.u32 4294901760, %v1087_v36  ;;  %v2640_v36 = vld [vmem:[#allocation2 + $0x120] sm:$0xff] }
 0x1ed   :  { %9034 = vmatpush3.msra.mxu1 %v11241_v7  ;;  %v1093_v47 = vand.u32 4294901760, %v1092_v40 }
 0x1ee   :  { %10036 = vmatprep.subr.bf16.mxu1 %v10035_v41  ;;  %9036 = vmatmul.mubr.f32.vlgmr.msra.gmra.mrb[0].mxu1 %v1056_v26  ;;  %v10039_v48 = vpack.c.bf16 %v1088_v25, %v1081_v42  ;;  %v2658_v26 = vand.u32 4294901760, %v2640_v36 }
 0x1ef   :  { %10038 = vmatpush3.bf16.msra.mxu1 %v10035_v41  ;;  %v1094_v50 = vsub.f32 %v1092_v40, %v1093_v47  ;;  %9048 = vmatprep.mubr.f32.mxu1 %v11160_v39  ;;  %v2642_v41 = vld [vmem:[#allocation2 + $0x140] sm:$0xff] }
 0x1f0   :  { %10040 = vmatprep.subr.bf16.mxu1 %v10039_v48  ;;  %v2664_v25 = vand.u32 4294901760, %v2642_v41 }
 0x1f1   :  { %v1095_v52 = vand.u32 4294901760, %v1094_v50 }
 0x1f3   :  { %10042 = vmatpush3.bf16.msra.mxu1 %v10039_v48 }
 0x1f4   :  { %9046 = vmatprep.subr.mxu1 %v1095_v52 }
 0x1f7   :  { %9047 = vmatpush3.msra.mxu1 %v1095_v52  ;;  %v11377_v52 = vsub.f32 %v2640_v36, %v2658_v26 }
 0x1f8   :  { %10044 = vmatprep.subr.bf16.mxu1 %v10043_v59  ;;  %9049 = vmatmul.mubr.f32.vlgmr.msra.gmra.mrb[0].mxu1 %v11212_v1 }
 0x1f9   :  { %10046 = vmatpush3.bf16.msra.mxu1 %v10043_v59  ;;  %9061 = vmatprep.mubr.f32.mxu1 %v11164_v49  ;;  %v11266_v49 = vand.u32 4294901760, %v1514_v4  ;;  %v2643_v59 = vld [vmem:[#allocation2 + $0x150] sm:$0xff] }
 0x1fa   :  { %10048 = vmatprep.subr.bf16.mxu1 %v10047_v60 }
 0x1fb   :  { %v1592_v34 = vsub.f32 %v1514_v4, %v11266_v49  ;;  %v11384_v4 = vsub.f32 %v2642_v41, %v2664_v25 }
 0x1fd   :  { %10050 = vmatpush3.bf16.msra.mxu1 %v10047_v60  ;;  %v2644_v60 = vld [vmem:[#allocation2 + $0x160] sm:$0xff] }
 0x1fe   :  { %9059 = vmatprep.subr.mxu1 %v1092_v40 }
 0x201   :  { %9060 = vmatpush3.msra.mxu1 %v1092_v40  ;;  %v2641_v40 = vld [vmem:[#allocation2 + $0x130] sm:$0xff] }
 0x202   :  { %10052 = vmatprep.subr.bf16.mxu1 %v11216_v51  ;;  %9062 = vmatmul.mubr.f32.vlgmr.msra.gmra.mrb[0].mxu1 %v11221_v29  ;;  %v1593_v29 = vand.u32 4294901760, %v1592_v34  ;;  %v2661_v42 = vand.u32 4294901760, %v2641_v40 }
 0x203   :  { %10054 = vmatpush3.bf16.msra.mxu1 %v11216_v51  ;;  %9074 = vmatprep.mubr.f32.mxu1 %v1044_v56  ;;  %v938_v56 = vld [vmem:[#allocation2 + $0xa0] sm:$0xff] }
 0x204   :  { %10056 = vmatprep.subr.bf16.mxu1 %v11235_v43  ;;  %v1517_v9 = vsel %vm962_vm1, %v938_v56, 0  ;;  %v1594_v45 = vsub.f32 %v1592_v34, %v1593_v29  ;;  %v11380_v61 = vpack.c.bf16 %v2664_v25, %v2661_v42 }
 0x205   :  { %v11272_v31 = vand.u32 4294901760, %v1517_v9 }
 0x206   :  { %v1595_v35 = vand.u32 4294901760, %v1594_v45 }
 0x207   :  { %10058 = vmatpush3.bf16.msra.mxu1 %v11235_v43  ;;  %v1602_v30 = vsub.f32 %v1517_v9, %v11272_v31 }
 0x208   :  { %9072 = vmatprep.subr.mxu1 %v11241_v7 }
 0x209   :  { %v1603_v15 = vand.u32 4294901760, %v1602_v30 }
 0x20b   :  { %9073 = vmatpush3.msra.mxu1 %v11241_v7  ;;  %v1604_v20 = vsub.f32 %v1602_v30, %v1603_v15 }
 0x20c   :  { %10060 = vmatprep.subr.bf16.mxu1 %v10059_v63  ;;  %9075 = vmatmul.mubr.f32.vlgmr.msra.gmra.mrb[0].mxu1 %v1054_v54  ;;  %v11282_v54 = vand.u32 4294901760, %v1519_v33 }
 0x20d   :  { %10062 = vmatpush3.bf16.msra.mxu1 %v10059_v63  ;;  %9087 = vmatprep.mubr.f32.mxu1 %v11160_v39  ;;  %v11382_v63 = vsub.f32 %v2641_v40, %v2661_v42 }
 0x20e   :  { %10064 = vmatprep.subr.bf16.mxu1 %v10063_v21 }
 0x211   :  { %10066 = vmatpush3.bf16.msra.mxu1 %v10063_v21  ;;  %v2667_v21 = vand.u32 4294901760, %v2643_v59 }
 0x212   :  { %9085 = vmatprep.subr.mxu1 %v1093_v47 }
 0x213   :  { %v11387_v56 = vsub.f32 %v2643_v59, %v2667_v21 }
 0x215   :  { %9086 = vmatpush3.msra.mxu1 %v1093_v47 }
 0x216   :  { %10068 = vmatprep.subr.bf16.mxu1 %v11216_v51  ;;  %9088 = vmatmul.mubr.f32.vlgmr.msra.gmra.mrb[0].mxu1 %v11212_v1 }
 0x217   :  { %10070 = vmatpush3.bf16.msra.mxu1 %v11216_v51  ;;  %9100 = vmatprep.mubr.f32.mxu1 %v11160_v39  ;;  %v1641_v39 = vsub.f32 %v1519_v33, %v11282_v54  ;;  %v1605_v51 = vand.u32 4294901760, %v1604_v20 }
 0x218   :  { %10072 = vmatprep.subr.bf16.mxu1 %v11235_v43 }
 0x219   :  { %v1642_v12 = vand.u32 4294901760, %v1641_v39 }
 0x21b   :  { %10074 = vmatpush3.bf16.msra.mxu1 %v11235_v43 }
 0x21c   :  { %9098 = vmatprep.subr.mxu1 %v11241_v7 }
 0x21f   :  { %9099 = vmatpush3.msra.mxu1 %v11241_v7 }
 0x220   :  { %10076 = vmatprep.subr.bf16.mxu1 %v11171_v2  ;;  %9101 = vmatmul.mubr.f32.vlgmr.msra.gmra.mrb[0].mxu1 %v11212_v1  ;;  %v1643_v1 = vsub.f32 %v1641_v39, %v1642_v12 }
 0x221   :  { %10078 = vmatpush3.bf16.msra.mxu1 %v11171_v2  ;;  %9113 = vmatprep.mubr.f32.mxu1 %v1595_v35 }
 0x222   :  { %10080 = vmatprep.subr.bf16.mxu1 %v11185_v6  ;;  %v1644_v44 = vand.u32 4294901760, %v1643_v1 }
 0x225   :  { %10082 = vmatpush3.bf16.msra.mxu1 %v11185_v6 }
 0x226   :  { %9111 = vmatprep.subr.mxu1 %v11282_v54 }
 0x229   :  { %9112 = vmatpush3.msra.mxu1 %v11282_v54 }
 0x22a   :  { %10084 = vmatprep.subr.bf16.mxu1 %v11187_v10  ;;  %9114 = vmatmul.mubr.f32.vlgmr.msra.gmra.mrb[0].mxu1 %v1605_v51 }
 0x22b   :  { %10086 = vmatpush3.bf16.msra.mxu1 %v11187_v10  ;;  %9126 = vmatprep.mubr.f32.mxu1 %v11266_v49  ;;  %v941_v10 = vld [vmem:[#allocation2 + $0xd0] sm:$0xff] }
 0x22c   :  { %10088 = vmatprep.subr.bf16.mxu1 %v11207_v55 }
 0x22f   :  { %10090 = vmatpush3.bf16.msra.mxu1 %v11207_v55  ;;  %v942_v55 = vld [vmem:[#allocation2 + $0xe0] sm:$0xff] }
 0x230   :  { %9124 = vmatprep.subr.mxu1 %v1644_v44  ;;  %v2066_v38 = vsel %vm962_vm1, %v942_v55, 0 }
 0x233   :  { %9125 = vmatpush3.msra.mxu1 %v1644_v44  ;;  %v2762_v44 = vand.u32 4294901760, %v11382_v63 }
 0x234   :  { %10092 = vmatprep.subr.bf16.mxu1 %v11176_v14  ;;  %9127 = vmatmul.mubr.f32.vlgmr.msra.gmra.mrb[0].mxu1 %v11272_v31 }
 0x235   :  { %10094 = vmatpush3.bf16.msra.mxu1 %v11176_v14  ;;  %9139 = vmatprep.mubr.f32.mxu1 %v1592_v34  ;;  %v2063_v14 = vsel %vm962_vm1, %v941_v10, 0  ;;  %v2769_v10 = vand.u32 4294901760, %v11384_v4 }
 0x236   :  { %10096 = vmatprep.subr.bf16.mxu1 %v11199_v28 }
 0x237   :  { %v2770_v55 = vsub.f32 %v11384_v4, %v2769_v10 }
 0x239   :  { %10098 = vmatpush3.bf16.msra.mxu1 %v11199_v28  ;;  %v11313_v28 = vand.u32 4294901760, %v2063_v14 }
 0x23a   :  { %9137 = vmatprep.subr.mxu1 %v1641_v39 }
 0x23b   :  { %v2142_v57 = vsub.f32 %v2063_v14, %v11313_v28 }
 0x23d   :  { %9138 = vmatpush3.msra.mxu1 %v1641_v39  ;;  %v2143_v43 = vand.u32 4294901760, %v2142_v57 }
 0x23e   :  { %10100 = vmatprep.subr.bf16.mxu1 %v11171_v2  ;;  %9140 = vmatmul.mubr.f32.vlgmr.msra.gmra.mrb[0].mxu1 %v1602_v30 }
 0x23f   :  { %10102 = vmatpush3.bf16.msra.mxu1 %v11171_v2  ;;  %9152 = vmatprep.mubr.f32.mxu1 %v1593_v29 }
 0x240   :  { %10104 = vmatprep.subr.bf16.mxu1 %v11185_v6 }
 0x243   :  { %10106 = vmatpush3.bf16.msra.mxu1 %v11185_v6 }
 0x244   :  { %9150 = vmatprep.subr.mxu1 %v11282_v54 }
 0x247   :  { %9151 = vmatpush3.msra.mxu1 %v11282_v54 }
 0x248   :  { %10108 = vmatprep.subr.bf16.mxu1 %v11178_v62  ;;  %9153 = vmatmul.mubr.f32.vlgmr.msra.gmra.mrb[0].mxu1 %v1603_v15  ;;  %v2755_v15 = vand.u32 4294901760, %v11377_v52 }
 0x249   :  { %10110 = vmatpush3.bf16.msra.mxu1 %v11178_v62  ;;  %9165 = vmatprep.mubr.f32.mxu1 %v11266_v49  ;;  %v11321_v62 = vand.u32 4294901760, %v2066_v38 }
 0x24a   :  { %10112 = vmatprep.subr.bf16.mxu1 %v11201_v16  ;;  %v2756_v51 = vsub.f32 %v11377_v52, %v2755_v15 }
 0x24b   :  { %v2152_v53 = vsub.f32 %v2066_v38, %v11321_v62  ;;  %v2771_v38 = vand.u32 4294901760, %v2770_v55 }
 0x24c   :  { %v2757_v1 = vand.u32 4294901760, %v2756_v51  ;;  %v11500_v51 = vld [vmem:[#allocation2 + $0x1a0] sm:$0xff] }
 0x24d   :  { %10114 = vmatpush3.bf16.msra.mxu1 %v11201_v16  ;;  %v2144_v16 = vsub.f32 %v2142_v57, %v2143_v43  ;;  %v2153_v18 = vand.u32 4294901760, %v2152_v53 }
 0x24e   :  { %9163 = vmatprep.subr.mxu1 %v1642_v12 }
 0x24f   :  { %v2145_v32 = vand.u32 4294901760, %v2144_v16  ;;  %v2154_v24 = vsub.f32 %v2152_v53, %v2153_v18 }
 0x251   :  { %9164 = vmatpush3.msra.mxu1 %v1642_v12 }
 0x252   :  { %10116 = vmatprep.subr.bf16.mxu1 %v11171_v2  ;;  %9166 = vmatmul.mubr.f32.vlgmr.msra.gmra.mrb[0].mxu1 %v11272_v31 }
 0x253   :  { %10118 = vmatpush3.bf16.msra.mxu1 %v11171_v2  ;;  %9178 = vmatprep.mubr.f32.mxu1 %v11266_v49  ;;  %v2191_v2 = vsub.f32 %v2069_v37, %v2084_v17  ;;  %v2670_v49 = vand.u32 4294901760, %v2644_v60 }
 0x254   :  { %10120 = vmatprep.subr.bf16.mxu1 %v11185_v6 }
 0x255   :  { %v2192_v3 = vand.u32 4294901760, %v2191_v2  ;;  %v11394_v29 = vpack.c.bf16 %v2670_v49, %v2667_v21 }
 0x257   :  { %10122 = vmatpush3.bf16.msra.mxu1 %v11185_v6  ;;  %v2155_v6 = vand.u32 4294901760, %v2154_v24  ;;  %v2193_v5 = vsub.f32 %v2191_v2, %v2192_v3 }
 0x258   :  { %9176 = vmatprep.subr.mxu1 %v11282_v54 }
 0x259   :  { %v2194_v7 = vand.u32 4294901760, %v2193_v5 }
 0x25b   :  { %9177 = vmatpush3.msra.mxu1 %v11282_v54 }
 0x25c   :  { %10124 = vmatprep.subr.bf16.mxu1 %v11173_v11  ;;  %9179 = vmatmul.mubr.f32.vlgmr.msra.gmra.mrb[0].mxu1 %v11272_v31  ;;  %v11396_v31 = vsub.f32 %v2644_v60, %v2670_v49 }
 0x25d   :  { %10126 = vmatpush3.bf16.msra.mxu1 %v11173_v11  ;;  %9191 = vmatprep.mubr.f32.mxu1 %v2145_v32 }
 0x25e   :  { %10128 = vmatprep.subr.bf16.mxu1 %v11189_v13 }
 0x261   :  { %10130 = vmatpush3.bf16.msra.mxu1 %v11189_v13 }
 0x262   :  { %9189 = vmatprep.subr.mxu1 %v2084_v17 }
 0x265   :  { %9190 = vmatpush3.msra.mxu1 %v2084_v17 }
 0x266   :  { %10132 = vmatprep.subr.bf16.mxu1 %v11193_v22  ;;  %9192 = vmatmul.mubr.f32.vlgmr.msra.gmra.mrb[0].mxu1 %v2155_v6  ;;  %v10202_v6 = vpack.c.bf16 %v11384_v4, %v11382_v63 }
 0x267   :  { %10134 = vmatpush3.bf16.msra.mxu1 %v11193_v22  ;;  %9204 = vmatprep.mubr.f32.mxu1 %v11313_v28 }
 0x268   :  { %10136 = vmatprep.subr.bf16.mxu1 %v11209_v58 }
 0x26b   :  { %10138 = vmatpush3.bf16.msra.mxu1 %v11209_v58  ;;  %v10785_v58 = vmov 0.0|0.0  }
 0x26c   :  { %9202 = vmatprep.subr.mxu1 %v2194_v7  ;;  %10171 = vmatprep.subr.bf16.mxu0 %v10785_v58 }
 0x26f   :  { %9203 = vmatpush3.msra.mxu1 %v2194_v7 }
 0x270   :  { %10140 = vmatprep.subr.bf16.mxu1 %v11180_v8  ;;  %9205 = vmatmul.mubr.f32.vlgmr.msra.gmra.mrb[0].mxu1 %v11321_v62 }
 0x271   :  { %10142 = vmatpush3.bf16.msra.mxu1 %v11180_v8  ;;  %9217 = vmatprep.mubr.f32.mxu1 %v2142_v57  ;;  %v2637_v8 = vld [vmem:[#allocation2 + $0xf0] sm:$0xff] }
 0x272   :  { %10144 = vmatprep.subr.bf16.mxu1 %v11203_v23  ;;  %v2649_v22 = vand.u32 4294901760, %v2637_v8 }
 0x274   :  { %v11371_v47 = vsub.f32 %v2637_v8, %v2649_v22  ;;  %v11426_v8 = vpack.c.bf16 %v2769_v10, %v2762_v44 }
 0x275   :  { %10146 = vmatpush3.bf16.msra.mxu1 %v11203_v23 }
 0x276   :  { %9215 = vmatprep.subr.mxu1 %v2191_v2  ;;  %v2734_v34 = vand.u32 4294901760, %v11371_v47 }
 0x278   :  { %v2735_v45 = vsub.f32 %v11371_v47, %v2734_v34 }
 0x279   :  { %9216 = vmatpush3.msra.mxu1 %v2191_v2 }
 0x27a   :  { %10148 = vmatprep.subr.bf16.mxu1 %v11173_v11  ;;  %9218 = vmatmul.mubr.f32.vlgmr.msra.gmra.mrb[0].mxu1 %v2152_v53  ;;  %v2736_v33 = vand.u32 4294901760, %v2735_v45 }
 0x27b   :  { %10150 = vmatpush3.bf16.msra.mxu1 %v11173_v11  ;;  %9230 = vmatprep.mubr.f32.mxu1 %v2143_v43  ;;  %v2776_v43 = vand.u32 4294901760, %v11387_v56 }
 0x27c   :  { %10152 = vmatprep.subr.bf16.mxu1 %v11189_v13 }
 0x27d   :  { %v2777_v53 = vsub.f32 %v11387_v56, %v2776_v43 }
 0x27f   :  { %10154 = vmatpush3.bf16.msra.mxu1 %v11189_v13  ;;  %v2778_v32 = vand.u32 4294901760, %v2777_v53  ;;  %v3203_v53 = vlaneseq }
 0x280   :  { %9228 = vmatprep.subr.mxu1 %v2084_v17 }
 0x283   :  { %9229 = vmatpush3.msra.mxu1 %v2084_v17 }
 0x284   :  { %10156 = vmatprep.subr.bf16.mxu1 %v11182_v27  ;;  %9231 = vmatmul.mubr.f32.vlgmr.msra.gmra.mrb[0].mxu1 %v2153_v18 }
 0x285   :  { %10158 = vmatpush3.bf16.msra.mxu1 %v11182_v27  ;;  %9243 = vmatprep.mubr.f32.mxu1 %v11313_v28  ;;  %v2638_v27 = vld [vmem:[#allocation2 + $0x100] sm:$0xff] }
 0x286   :  { %10160 = vmatprep.subr.bf16.mxu1 %v11205_v46  ;;  %v2652_v23 = vand.u32 4294901760, %v2638_v27 }
 0x288   :  { %v11373_v48 = vsub.f32 %v2638_v27, %v2652_v23 }
 0x289   :  { %10162 = vmatpush3.bf16.msra.mxu1 %v11205_v46  ;;  %v11363_v46 = vpack.c.bf16 %v2652_v23, %v2649_v22 }
 0x28a   :  { %9241 = vmatprep.subr.mxu1 %v2192_v3  ;;  %v2741_v9 = vand.u32 4294901760, %v11373_v48  ;;  %v10196_v2 = vpack.c.bf16 %v11373_v48, %v11371_v47 }
 0x28b   :  { %10173 = vmatpush3.bf16.msra.mxu0 %v11363_v46 }
 0x28c   :  { %10174 = vmatprep.subr.bf16.mxu0 %v10785_v58  ;;  %v2742_v30 = vsub.f32 %v11373_v48, %v2741_v9  ;;  %v11422_v5 = vpack.c.bf16 %v2741_v9, %v2734_v34 }
 0x28d   :  { %9242 = vmatpush3.msra.mxu1 %v2192_v3  ;;  %v10205_v3 = vpack.c.bf16 %v11396_v31, %v11387_v56 }
 0x28e   :  { %10164 = vmatprep.subr.bf16.mxu1 %v11173_v11  ;;  %9244 = vmatmul.mubr.f32.vlgmr.msra.gmra.mrb[0].mxu1 %v11321_v62  ;;  %v2743_v35 = vand.u32 4294901760, %v2742_v30 }
 0x28f   :  { %10166 = vmatpush3.bf16.msra.mxu1 %v11173_v11  ;;  %9256 = vmatprep.mubr.f32.mxu1 %v11313_v28  ;;  %v2639_v11 = vld [vmem:[#allocation2 + $0x110] sm:$0xff]  ;;  %v2763_v28 = vsub.f32 %v11382_v63, %v2762_v44 }
 0x290   :  { %10168 = vmatprep.subr.bf16.mxu1 %v11189_v13  ;;  %v2655_v19 = vand.u32 4294901760, %v2639_v11  ;;  %v10184_v39 = vpack.c.bf16 %v2743_v35, %v2736_v33 }
 0x291   :  { %v2764_v57 = vand.u32 4294901760, %v2763_v28 }
 0x292   :  { %v11375_v50 = vsub.f32 %v2639_v11, %v2655_v19 }
 0x293   :  { %10170 = vmatpush3.bf16.msra.mxu1 %v11189_v13  ;;  %v11368_v13 = vpack.c.bf16 %v2658_v26, %v2655_v19  ;;  %v10190_v16 = vpack.c.bf16 %v2771_v38, %v2764_v57 }
 0x294   :  { %9254 = vmatprep.subr.mxu1 %v2084_v17  ;;  %v2748_v54 = vand.u32 4294901760, %v11375_v50  ;;  %v10199_v24 = vpack.c.bf16 %v11377_v52, %v11375_v50 }
 0x295   :  { %10176 = vmatpush3.bf16.msra.mxu0 %v11368_v13 }
 0x296   :  { %10177 = vmatprep.subr.bf16.mxu0 %v10785_v58  ;;  %v2749_v20 = vsub.f32 %v11375_v50, %v2748_v54  ;;  %v11424_v7 = vpack.c.bf16 %v2755_v15, %v2748_v54 }
 0x297   :  { %9255 = vmatpush3.msra.mxu1 %v2084_v17 }
 0x298   :  { %9257 = vmatmul.mubr.f32.vlgmr.msra.gmra.mrb[0].mxu1 %v11321_v62  ;;  %v2750_v12 = vand.u32 4294901760, %v2749_v20  ;;  %v2783_v62 = vand.u32 4294901760, %v11396_v31 }
 0x299   :  { %10179 = vmatpush3.bf16.msra.mxu0 %v11380_v61 }
 0x29a   :  { %10180 = vmatprep.subr.bf16.mxu0 %v10785_v58  ;;  %v10187_v14 = vpack.c.bf16 %v2757_v1, %v2750_v12  ;;  %v2784_v37 = vsub.f32 %v11396_v31, %v2783_v62  ;;  %v11428_v27 = vpack.c.bf16 %v2783_v62, %v2776_v43  ;;  %v11502_v12 = vld [vmem:[#allocation2 + $0x1b0] sm:$0xff]  ;;  %v3741_v1 = vand.u32 4294901760, %v11500_v51 }
 0x29b   :  { %v3744_v44 = vand.u32 4294901760, %v11502_v12 }
 0x29c   :  { %v2785_v17 = vand.u32 4294901760, %v2784_v37  ;;  %v11509_v10 = vsub.f32 %v11500_v51, %v3741_v1  ;;  %v11516_v37 = vshrl.u32 %v3203_v53, 7 }
 0x29d   :  { %10182 = vmatpush3.bf16.msra.mxu0 %v11394_v29 }
 0x29e   :  { %10183 = vmatprep.subr.bf16.mxu0 %v10785_v58  ;;  %v10193_v18 = vpack.c.bf16 %v2785_v17, %v2778_v32  ;;  %v3218_v32 = vld [vmem:[#allocation2 + $0x190] sm:$0xff] }
 0x36b   :  { %v11430_v22 = vpop.f32.mrb[0].mxu1 }
 0x36c   :  { %v2616_v23 = vsel %vm2614_vm4, %v11430_v22, 0.0  ;;  %v2625_v11 = vmul.f32 %v11430_v22, %v11430_v22  ;;  %v11436_v36 = vpop.f32.mrb[1].mxu1 }
 0x36d   :  { %v2615_v19 = vsel %vm2614_vm4, %v11436_v36, 0.0  ;;  %v2624_v26 = vmul.f32 %v11436_v36, %v11436_v36 }
 0x36e   :  { %v2627_v40 = vsel %vm2614_vm4, %v2625_v11, 0.0  ;;  %v2617_v41 = vadd.f32 %v2616_v23, %v2615_v19  ;;  %v3211_v19 = vsub.s32 1, %v11516_v37 }
 0x36f   :  { %v2626_v42 = vsel %vm2614_vm4, %v2624_v26, 0.0 }
 0x370   :  { %v2618_v25 = vrot.slane %v2617_v41, 4  ;;  %v2628_v47 = vadd.f32 %v2627_v40, %v2626_v42 }
 0x372   :  { %v2619_v48 = vadd.f32 %v2618_v25, %v2617_v41  ;;  %v2629_v50 = vrot.slane %v2628_v47, 4 }
 0x374   :  { %v2620_v52 = vrot.slane %v2619_v48, 2  ;;  %v2630_v59 = vadd.f32 %v2629_v50, %v2628_v47 }
 0x376   :  { %v2621_v60 = vadd.f32 %v2620_v52, %v2619_v48  ;;  %v2631_v63 = vrot.slane %v2630_v59, 2 }
 0x378   :  { %v2622_v4 = vrot.slane %v2621_v60, 1  ;;  %v2632_v21 = vadd.f32 %v2631_v63, %v2630_v59 }
 0x37a   :  { %v2633_v49 = vrot.slane %v2632_v21, 1  ;;  %v2623_v56 = vadd.f32 %v2622_v4, %v2621_v60 }
 0x37c   :  { %v2634_v34 = vadd.f32 %v2633_v49, %v2632_v21 }
 0x37e   :  { %v2636_v9 = vsel %vm2635_vm5, %v2623_v56, %v2634_v34 }
 0x37f   :  { %v2646_v31 = vsel %vm2614_vm4, %v2636_v9, 0 }
 0x380   :  { %v2721_v45 = vand.u32 4294901760, %v2646_v31 }
 0x382   :  { %v2722_v30 = vsub.f32 %v2646_v31, %v2721_v45 }
 0x384   :  { %v2723_v33 = vand.u32 4294901760, %v2722_v30 }
 0x386   :  { %v2724_v35 = vsub.f32 %v2722_v30, %v2723_v33 }
 0x388   :  { %v2725_v54 = vand.u32 4294901760, %v2724_v35  ;;  %v11538_v35 = vpack.c.bf16 %v3744_v44, %v3741_v1  ;;  %v3735_v1 = vld [vmem:[#allocation2 + $0x200] sm:$0xff] }
 0x38a   :  { %9276 = vmatmul.mubr.f32.vlgmr.msra.gmra.mrb[10].mxu0 %v2725_v54  ;;  %v3731_v54 = vld [vmem:[#allocation2 + $0x1c0] sm:$0xff] }
 0x38b   :  { %10185 = vmatpush3.bf16.msra.mxu0 %v10184_v39  ;;  %9294 = vmatprep.mubr.msk.f32.mxu0 %vm10786_vm3, %v10783_v0 }
 0x38c   :  { %10186 = vmatprep.subr.bf16.mxu0 %v10785_v58 }
 0x38f   :  { %10188 = vmatpush3.bf16.msra.mxu0 %v10187_v14  ;;  %v11514_v14 = vsub.f32 %v11502_v12, %v3744_v44  ;;  %v3736_v44 = vld [vmem:[#allocation2 + $0x210] sm:$0xff] }
 0x390   :  { %10189 = vmatprep.subr.bf16.mxu0 %v10785_v58 }
 0x393   :  { %10191 = vmatpush3.bf16.msra.mxu0 %v10190_v16 }
 0x394   :  { %10192 = vmatprep.subr.bf16.mxu0 %v10785_v58 }
 0x397   :  { %10194 = vmatpush3.bf16.msra.mxu0 %v10193_v18  ;;  %v3185_v18 = vld [vmem:[#allocation2 + $0x170] sm:$0x3] }
 0x398   :  { %10195 = vmatprep.subr.bf16.mxu0 %v10785_v58 }
 0x39a   :  { %9295 = vmatmul.mubr.f32.vlgmr.msra.gmra.mrb[10].mxu0 %v2721_v45 }
 0x39b   :  { %10197 = vmatpush3.bf16.msra.mxu0 %v10196_v2  ;;  %9313 = vmatprep.mubr.msk.f32.mxu0 %vm10786_vm3, %v10783_v0 }
 0x39c   :  { %10198 = vmatprep.subr.bf16.mxu0 %v10785_v58 }
 0x39f   :  { %10200 = vmatpush3.bf16.msra.mxu0 %v10199_v24  ;;  %v3205_v24 = vsub.s32 0, %v11516_v37  ;;  %v7134_v37 = vld [vmem:[#allocation2 + $0x2e0] sm:$0xff] }
 0x3a0   :  { %10201 = vmatprep.subr.bf16.mxu0 %v10785_v58 }
 0x3a3   :  { %10203 = vmatpush3.bf16.msra.mxu0 %v10202_v6  ;;  %v3224_v6 = vsel %vm3219_vm6, %v3218_v32, 0 }
 0x3a4   :  { %10204 = vmatprep.subr.bf16.mxu0 %v10785_v58 }
 0x3a7   :  { %10206 = vmatpush3.bf16.msra.mxu0 %v10205_v3 }
 0x3a8   :  { %10207 = vmatprep.subr.bf16.mxu0 %v10785_v58 }
 0x3aa   :  { %9314 = vmatmul.mubr.f32.vlgmr.msra.gmra.mrb[10].mxu0 %v2722_v30 }
 0x3ab   :  { %10209 = vmatpush3.bf16.msra.mxu0 %v11363_v46  ;;  %9332 = vmatprep.mubr.msk.f32.mxu0 %vm10786_vm3, %v10783_v0 }
 0x3ac   :  { %10210 = vmatprep.subr.bf16.mxu0 %v10785_v58 }
 0x3af   :  { %10212 = vmatpush3.bf16.msra.mxu0 %v11368_v13 }
 0x3b0   :  { %10213 = vmatprep.subr.bf16.mxu0 %v10785_v58 }
 0x3b3   :  { %10215 = vmatpush3.bf16.msra.mxu0 %v11380_v61 }
 0x3b4   :  { %10216 = vmatprep.subr.bf16.mxu0 %v10785_v58 }
 0x3b7   :  { %10218 = vmatpush3.bf16.msra.mxu0 %v11394_v29 }
 0x3b8   :  { %10219 = vmatprep.subr.bf16.mxu0 %v10785_v58 }
 0x3ba   :  { %9333 = vmatmul.mubr.f32.vlgmr.msra.gmra.mrb[10].mxu0 %v2723_v33 }
 0x3bb   :  { %10221 = vmatpush3.bf16.msra.mxu0 %v11422_v5  ;;  %9351 = vmatprep.mubr.msk.f32.mxu0 %vm10786_vm3, %v10783_v0 }
 0x3bc   :  { %10222 = vmatprep.subr.bf16.mxu0 %v10785_v58 }
 0x3bf   :  { %10224 = vmatpush3.bf16.msra.mxu0 %v11424_v7 }
 0x3c0   :  { %10225 = vmatprep.subr.bf16.mxu0 %v10785_v58 }
 0x3c3   :  { %10227 = vmatpush3.bf16.msra.mxu0 %v11426_v8  ;;  %v3303_v8 = vand.u32 4294901760, %v3224_v6 }
 0x3c4   :  { %10228 = vmatprep.subr.bf16.mxu0 %v10785_v58 }
 0x3c5   :  { %v3304_v40 = vsub.f32 %v3224_v6, %v3303_v8 }
 0x3c7   :  { %10230 = vmatpush3.bf16.msra.mxu0 %v11428_v27  ;;  %v3305_v47 = vand.u32 4294901760, %v3304_v40 }
 0x3c8   :  { %10231 = vmatprep.subr.bf16.mxu0 %v10785_v58 }
 0x3c9   :  { %v3306_v60 = vsub.f32 %v3304_v40, %v3305_v47 }
 0x3ca   :  { %9352 = vmatmul.mubr.f32.vlgmr.msra.gmra.mrb[10].mxu0 %v2721_v45 }
 0x3cb   :  { %10233 = vmatpush3.bf16.msra.mxu0 %v11363_v46  ;;  %9370 = vmatprep.mubr.msk.f32.mxu0 %vm10786_vm3, %v10783_v0  ;;  %v3217_v46 = vld [vmem:[#allocation2 + $0x180] sm:$0xff] }
 0x3cc   :  { %10234 = vmatprep.subr.bf16.mxu0 %v10785_v58  ;;  %v3221_v15 = vsel %vm3219_vm6, %v3217_v46, 0  ;;  %v3732_v46 = vld [vmem:[#allocation2 + $0x1d0] sm:$0xff] }
 0x3cd   :  { %v11491_v39 = vand.u32 4294901760, %v3221_v15 }
 0x3cf   :  { %10236 = vmatpush3.bf16.msra.mxu0 %v11368_v13  ;;  %v11494_v13 = vsub.f32 %v3221_v15, %v11491_v39  ;;  %v3747_v15 = vand.u32 4294901760, %v3731_v54 }
 0x3d0   :  { %10237 = vmatprep.subr.bf16.mxu0 %v10785_v58 }
 0x3d3   :  { %10239 = vmatpush3.bf16.msra.mxu0 %v11380_v61  ;;  %v3295_v61 = vand.u32 4294901760, %v11494_v13 }
 0x3d4   :  { %10240 = vmatprep.subr.bf16.mxu0 %v10785_v58 }
 0x3d7   :  { %10242 = vmatpush3.bf16.msra.mxu0 %v11394_v29  ;;  %v3296_v29 = vsub.f32 %v11494_v13, %v3295_v61 }
 0x3d8   :  { %10345 = vmatprep.subr.bf16.mxu0 %v10785_v58 }
 0x3d9   :  { %v3297_v20 = vand.u32 4294901760, %v3296_v29  ;;  %v3734_v29 = vld [vmem:[#allocation2 + $0x1f0] sm:$0xff] }
 0x3da   :  { %9371 = vmatmul.mubr.f32.vlgmr.msra.gmra.mrb[10].mxu0 %v2721_v45  ;;  %v3756_v51 = vand.u32 4294901760, %v3734_v29 }
 0x3db   :  { %9548 = vmatprep.mubr.msk.f32.mxu0 %vm10786_vm3, %v10783_v0  ;;  %9377 = vmatprep.mubr.f32.mxu1 %v3297_v20 }
 0x3dc   :  { %v11559_v53 = vsub.f32 %v3734_v29, %v3756_v51 }
 0x4ad   :  { %v3181_v28 = vpop.f32.mrb[10].mxu0 }
 0x4ae   :  { %v3186_v55 = vmul.f32 0.0078125, %v3181_v28  ;;  %v9372_v57 = vpop.f32.mrb[11].mxu0  ;;  %v3759_v28 = vand.u32 4294901760, %v3735_v1 }
 0x4af   :  { %v3826_v57 = vand.u32 4294901760, %v11509_v10 }
 0x4b0   :  { %v3187_v38 = vmul.f32 %v3186_v55, %v3186_v55 }
 0x4b2   :  { %v3189_v43 = vrot.slane %v3187_v38, 7  ;;  %v3833_v38 = vand.u32 4294901760, %v11514_v14 }
 0x4b4   :  { %v3191_v62 = vsub.f32 %v3186_v55, %v3189_v43  ;;  %v11553_v43 = vsub.f32 %v3731_v54, %v3747_v15  ;;  %v3834_v6 = vsub.f32 %v11514_v14, %v3833_v38 }
 0x4b6   :  { %v3192_v16 = vadd.f32 1e-05, %v3191_v62 }
 0x4b8   :  { %10704 = vrsqrt.f32 %v3192_v16 }
 0x4c2   :  { %v10705_v17 = vpop.eup %10704 }
 0x4c3   :  { %v3195_v2 = vrot.slane %v10705_v17, 1  ;;  %v11564_v17 = vsub.f32 %v3735_v1, %v3759_v28  ;;  %v4283_v1 = vld [vmem:[#allocation2 + $0x230] sm:$0xff] }
 0x4c5   :  { %v3197_v3 = vmul.f32 %v3195_v2, %v3185_v18  ;;  %v3827_v2 = vsub.f32 %v11509_v10, %v3826_v57 }
 0x4c7   :  { %v3198_v5 = vmul.f32 %v3197_v3, %v3186_v55  ;;  %v3206_v7 = vrot.slane %v3197_v3, %v3205_v24  ;;  %v3762_v55 = vand.u32 4294901760, %v3736_v44  ;;  %v3828_v3 = vand.u32 4294901760, %v3827_v2 }
 0x4c9   :  { %v3200_v27 = vrot.slane %v3198_v5, 7  ;;  %v3207_v23 = vmul.f32 %v3206_v7, %v11436_v36  ;;  %v3208_v11 = vmul.f32 %v11430_v22, %v3206_v7  ;;  %v3307_v22 = vand.u32 4294901760, %v3306_v60 }
 0x4ca   :  { %v11562_v32 = vpack.c.bf16 %v3762_v55, %v3759_v28  ;;  %v3840_v5 = vand.u32 4294901760, %v11553_v43  ;;  %v4294_v28 = vand.u32 4294901760, %v4283_v1 }
 0x4cb   :  { %v3202_v26 = vsub.f32 %v3185_v18, %v3200_v27  ;;  %v11566_v18 = vsub.f32 %v3736_v44, %v3762_v55 }
 0x4cc   :  { %v3841_v27 = vsub.f32 %v11553_v43, %v3840_v5 }
 0x4cd   :  { %v3212_v41 = vrot.slane %v3202_v26, %v3211_v19  ;;  %v3875_v60 = vand.u32 4294901760, %v11566_v18 }
 0x4ce   :  { %v3842_v26 = vand.u32 4294901760, %v3841_v27 }
 0x4cf   :  { %v3213_v42 = vadd.f32 %v3212_v41, %v3207_v23  ;;  %v3214_v25 = vadd.f32 %v3212_v41, %v3208_v11 }
 0x4d1   :  { %v3215_v48 = vmax.f32 %v3213_v42, 0.0  ;;  %v3216_v50 = vmax.f32 %v3214_v25, 0.0  ;;  %v3861_v42 = vand.u32 4294901760, %v11559_v53 }
 0x4d3   :  { %v3227_v52 = vand.u32 4294901760, %v3215_v48  ;;  %v3230_v59 = vand.u32 4294901760, %v3216_v50 }
 0x4d5   :  { %v10243_v63 = vpack.c.bf16 %v3230_v59, %v3227_v52  ;;  %v3315_v4 = vsub.f32 %v3215_v48, %v3227_v52  ;;  %v3322_v36 = vsub.f32 %v3216_v50, %v3230_v59  ;;  %v3862_v48 = vsub.f32 %v11559_v53, %v3861_v42 }
 0x4d6   :  { %v3868_v59 = vand.u32 4294901760, %v11564_v17 }
 0x4d7   :  { %10244 = vmatprep.subr.bf16.mxu1 %v10243_v63  ;;  %v3316_v21 = vand.u32 4294901760, %v3315_v4  ;;  %v3323_v49 = vand.u32 4294901760, %v3322_v36  ;;  %v10251_v56 = vpack.c.bf16 %v3322_v36, %v3315_v4  ;;  %v3863_v52 = vand.u32 4294901760, %v3862_v48 }
 0x4d8   :  { %10246 = vmatpush3.bf16.msra.mxu1 %v10243_v63  ;;  %v10325_v54 = vpack.c.bf16 %v3875_v60, %v3868_v59 }
 0x4d9   :  { %v3317_v34 = vsub.f32 %v3315_v4, %v3316_v21  ;;  %v3324_v9 = vsub.f32 %v3322_v36, %v3323_v49  ;;  %v10259_v31 = vpack.c.bf16 %v3323_v49, %v3316_v21  ;;  %v3869_v4 = vsub.f32 %v11564_v17, %v3868_v59 }
 0x4da   :  { %v3876_v36 = vsub.f32 %v11566_v18, %v3875_v60 }
 0x4db   :  { %9378 = vmatmul.mubr.f32.vlgmr.msra.gmra.mrb[2].mxu1 %v3307_v22  ;;  %v3318_v45 = vand.u32 4294901760, %v3317_v34  ;;  %v3325_v30 = vand.u32 4294901760, %v3324_v9  ;;  %v3870_v22 = vand.u32 4294901760, %v3869_v4 }
 0x4dc   :  { %9384 = vmatprep.mubr.f32.mxu1 %v11491_v39  ;;  %v3877_v21 = vand.u32 4294901760, %v3876_v36 }
 0x4dd   :  { %v10247_v33 = vpack.c.bf16 %v3325_v30, %v3318_v45  ;;  %v10316_v45 = vpack.c.bf16 %v3833_v38, %v3826_v57 }
 0x4de   :  { %v10289_v49 = vpack.c.bf16 %v3877_v21, %v3870_v22 }
 0x4df   :  { %10248 = vmatprep.subr.bf16.mxu1 %v10247_v33 }
 0x4e0   :  { %10250 = vmatpush3.bf16.msra.mxu1 %v10247_v33 }
 0x4e1   :  { %10252 = vmatprep.subr.bf16.mxu1 %v10251_v56 }
 0x4e3   :  { %9385 = vmatmul.mubr.f32.vlgmr.msra.gmra.mrb[2].mxu1 %v3303_v8 }
 0x4e4   :  { %10254 = vmatpush3.bf16.msra.mxu1 %v10251_v56  ;;  %9391 = vmatprep.mubr.f32.mxu1 %v11494_v13  ;;  %v10292_v56 = vpack.c.bf16 %v11514_v14, %v11509_v10 }
 0x4e5   :  { %10256 = vmatprep.subr.bf16.mxu1 %v10243_v63 }
 0x4eb   :  { %9392 = vmatmul.mubr.f32.vlgmr.msra.gmra.mrb[2].mxu1 %v3304_v40 }
 0x4ec   :  { %10258 = vmatpush3.bf16.msra.mxu1 %v10243_v63  ;;  %9398 = vmatprep.mubr.f32.mxu1 %v3295_v61  ;;  %v3733_v61 = vld [vmem:[#allocation2 + $0x1e0] sm:$0xff] }
 0x4ed   :  { %10260 = vmatprep.subr.bf16.mxu1 %v10259_v31  ;;  %v3753_v20 = vand.u32 4294901760, %v3733_v61 }
 0x4ef   :  { %v11548_v12 = vpack.c.bf16 %v3756_v51, %v3753_v20  ;;  %v11557_v16 = vsub.f32 %v3733_v61, %v3753_v20 }
 0x4f1   :  { %v3854_v41 = vand.u32 4294901760, %v11557_v16  ;;  %v10298_v9 = vpack.c.bf16 %v11559_v53, %v11557_v16 }
 0x4f3   :  { %9399 = vmatmul.mubr.f32.vlgmr.msra.gmra.mrb[2].mxu1 %v3305_v47  ;;  %v3855_v47 = vsub.f32 %v11557_v16, %v3854_v41  ;;  %v10322_v33 = vpack.c.bf16 %v3861_v42, %v3854_v41 }
 0x4f4   :  { %10262 = vmatpush3.bf16.msra.mxu1 %v10259_v31  ;;  %9405 = vmatprep.mubr.f32.mxu1 %v11491_v39  ;;  %v10301_v31 = vpack.c.bf16 %v11566_v18, %v11564_v17  ;;  %v4285_v17 = vld [vmem:[#allocation2 + $0x250] sm:$0xff] }
 0x4f5   :  { %10264 = vmatprep.subr.bf16.mxu1 %v10243_v63  ;;  %v3856_v50 = vand.u32 4294901760, %v3855_v47  ;;  %v4300_v2 = vand.u32 4294901760, %v4285_v17 }
 0x4fb   :  { %9406 = vmatmul.mubr.f32.vlgmr.msra.gmra.mrb[2].mxu1 %v3303_v8 }
 0x4fc   :  { %10266 = vmatpush3.bf16.msra.mxu1 %v10243_v63  ;;  %9412 = vmatprep.mubr.f32.mxu1 %v11491_v39  ;;  %v3750_v39 = vand.u32 4294901760, %v3732_v46  ;;  %v10286_v63 = vpack.c.bf16 %v3863_v52, %v3856_v50 }
 0x4fd   :  { %10267 = vmatprep.subr.bf16.mxu1 %v10785_v58 }
 0x4fe   :  { %v11544_v13 = vpack.c.bf16 %v3750_v39, %v3747_v15  ;;  %v11555_v62 = vsub.f32 %v3732_v46, %v3750_v39 }
 0x500   :  { %v3847_v7 = vand.u32 4294901760, %v11555_v62  ;;  %v10295_v34 = vpack.c.bf16 %v11555_v62, %v11553_v43 }
 0x502   :  { %v3848_v23 = vsub.f32 %v11555_v62, %v3847_v7  ;;  %v10319_v30 = vpack.c.bf16 %v3847_v7, %v3840_v5 }
 0x503   :  { %9413 = vmatmul.mubr.f32.vlgmr.msra.gmra.mrb[2].mxu1 %v3303_v8  ;;  %v3835_v8 = vand.u32 4294901760, %v3834_v6 }
 0x504   :  { %10269 = vmatpush3.bf16.msra.mxu1 %v11538_v35  ;;  %9431 = vmatprep.mubr.msk.f32.mxu1 %vm10786_vm3, %v10783_v0  ;;  %v3849_v40 = vand.u32 4294901760, %v3848_v23 }
 0x505   :  { %10270 = vmatprep.subr.bf16.mxu1 %v10785_v58  ;;  %v10280_v11 = vpack.c.bf16 %v3835_v8, %v3828_v3  ;;  %v4392_v3 = vsub.f32 %v4285_v17, %v4300_v2 }
 0x506   :  { %v10283_v25 = vpack.c.bf16 %v3849_v40, %v3842_v26 }
 0x507   :  { %v4393_v7 = vand.u32 4294901760, %v4392_v3 }
 0x508   :  { %10272 = vmatpush3.bf16.msra.mxu1 %v11544_v13 }
 0x509   :  { %10273 = vmatprep.subr.bf16.mxu1 %v10785_v58  ;;  %v4394_v27 = vsub.f32 %v4392_v3, %v4393_v7 }
 0x50c   :  { %10275 = vmatpush3.bf16.msra.mxu1 %v11548_v12 }
 0x50d   :  { %10276 = vmatprep.subr.bf16.mxu1 %v10785_v58 }
 0x510   :  { %10278 = vmatpush3.bf16.msra.mxu1 %v11562_v32 }
 0x511   :  { %10279 = vmatprep.subr.bf16.mxu1 %v10785_v58 }
 0x5d6   :  { %v9414_v46 = vpop.f32.mrb[2].mxu1 }
 0x5d7   :  { %v3718_v15 = vpop.f32.mrb[3].mxu1 }
 0x5d8   :  { %v3728_v39 = vmax.f32 %v3718_v15, %v9414_v46 }
 0x5da   :  { %v3738_v61 = vsel %vm2614_vm4, %v3728_v39, 0 }
 0x5db   :  { %v3813_v29 = vand.u32 4294901760, %v3738_v61 }
 0x5dd   :  { %v3814_v10 = vsub.f32 %v3738_v61, %v3813_v29 }
 0x5df   :  { %v3815_v14 = vand.u32 4294901760, %v3814_v10 }
 0x5e1   :  { %v3816_v20 = vsub.f32 %v3814_v10, %v3815_v14 }
 0x5e3   :  { %v3817_v51 = vand.u32 4294901760, %v3816_v20 }
 0x5e5   :  { %9432 = vmatmul.mubr.f32.vlgmr.msra.gmra.mrb[4].mxu1 %v3817_v51 }
 0x5e6   :  { %10281 = vmatpush3.bf16.msra.mxu1 %v10280_v11  ;;  %9450 = vmatprep.mubr.msk.f32.mxu1 %vm10786_vm3, %v10783_v0  ;;  %v4395_v11 = vand.u32 4294901760, %v4394_v27 }
 0x5e7   :  { %10282 = vmatprep.subr.bf16.mxu1 %v10785_v58 }
 0x5ea   :  { %10284 = vmatpush3.bf16.msra.mxu1 %v10283_v25 }
 0x5eb   :  { %10285 = vmatprep.subr.bf16.mxu1 %v10785_v58 }
 0x5ee   :  { %10287 = vmatpush3.bf16.msra.mxu1 %v10286_v63 }
 0x5ef   :  { %10288 = vmatprep.subr.bf16.mxu1 %v10785_v58 }
 0x5f2   :  { %10290 = vmatpush3.bf16.msra.mxu1 %v10289_v49 }
 0x5f3   :  { %10291 = vmatprep.subr.bf16.mxu1 %v10785_v58 }
 0x5f5   :  { %9451 = vmatmul.mubr.f32.vlgmr.msra.gmra.mrb[4].mxu1 %v3813_v29 }
 0x5f6   :  { %10293 = vmatpush3.bf16.msra.mxu1 %v10292_v56  ;;  %9469 = vmatprep.mubr.msk.f32.mxu1 %vm10786_vm3, %v10783_v0 }
 0x5f7   :  { %10294 = vmatprep.subr.bf16.mxu1 %v10785_v58 }
 0x5fa   :  { %10296 = vmatpush3.bf16.msra.mxu1 %v10295_v34 }
 0x5fb   :  { %10297 = vmatprep.subr.bf16.mxu1 %v10785_v58 }
 0x5fe   :  { %10299 = vmatpush3.bf16.msra.mxu1 %v10298_v9 }
 0x5ff   :  { %10300 = vmatprep.subr.bf16.mxu1 %v10785_v58 }
 0x602   :  { %10302 = vmatpush3.bf16.msra.mxu1 %v10301_v31 }
 0x603   :  { %10303 = vmatprep.subr.bf16.mxu1 %v10785_v58 }
 0x605   :  { %9470 = vmatmul.mubr.f32.vlgmr.msra.gmra.mrb[4].mxu1 %v3814_v10 }
 0x606   :  { %10305 = vmatpush3.bf16.msra.mxu1 %v11538_v35  ;;  %9488 = vmatprep.mubr.msk.f32.mxu1 %vm10786_vm3, %v10783_v0 }
 0x607   :  { %10306 = vmatprep.subr.bf16.mxu1 %v10785_v58 }
 0x60a   :  { %10308 = vmatpush3.bf16.msra.mxu1 %v11544_v13 }
 0x60b   :  { %10309 = vmatprep.subr.bf16.mxu1 %v10785_v58 }
 0x60e   :  { %10311 = vmatpush3.bf16.msra.mxu1 %v11548_v12 }
 0x60f   :  { %10312 = vmatprep.subr.bf16.mxu1 %v10785_v58 }
 0x612   :  { %10314 = vmatpush3.bf16.msra.mxu1 %v11562_v32 }
 0x613   :  { %10315 = vmatprep.subr.bf16.mxu1 %v10785_v58 }
 0x615   :  { %9489 = vmatmul.mubr.f32.vlgmr.msra.gmra.mrb[4].mxu1 %v3815_v14 }
 0x616   :  { %10317 = vmatpush3.bf16.msra.mxu1 %v10316_v45  ;;  %9507 = vmatprep.mubr.msk.f32.mxu1 %vm10786_vm3, %v10783_v0 }
 0x617   :  { %10318 = vmatprep.subr.bf16.mxu1 %v10785_v58 }
 0x61a   :  { %10320 = vmatpush3.bf16.msra.mxu1 %v10319_v30  ;;  %v4775_v30 = vld [vmem:[#allocation2 + $0x260] sm:$0xff] }
 0x61b   :  { %10321 = vmatprep.subr.bf16.mxu1 %v10785_v58 }
 0x61e   :  { %10323 = vmatpush3.bf16.msra.mxu1 %v10322_v33  ;;  %v4778_v33 = vrot.slane %v4775_v30, 4 }
 0x61f   :  { %10324 = vmatprep.subr.bf16.mxu1 %v10785_v58 }
 0x622   :  { %10326 = vmatpush3.bf16.msra.mxu1 %v10325_v54  ;;  %v4784_v54 = vsel %vm4783_vm8, %v4778_v33, 0 }
 0x623   :  { %10327 = vmatprep.subr.bf16.mxu1 %v10785_v58  ;;  %v4852_v46 = vand.u32 4294901760, %v4784_v54 }
 0x625   :  { %9508 = vmatmul.mubr.f32.vlgmr.msra.gmra.mrb[4].mxu1 %v3813_v29  ;;  %v4853_v15 = vsub.f32 %v4784_v54, %v4852_v46 }
 0x626   :  { %10329 = vmatpush3.bf16.msra.mxu1 %v11538_v35  ;;  %9526 = vmatprep.mubr.msk.f32.mxu1 %vm10786_vm3, %v10783_v0  ;;  %v4282_v35 = vld [vmem:[#allocation2 + $0x220] sm:$0xff] }
 0x627   :  { %10330 = vmatprep.subr.bf16.mxu1 %v10785_v58  ;;  %v4291_v44 = vand.u32 4294901760, %v4282_v35  ;;  %v4854_v39 = vand.u32 4294901760, %v4853_v15 }
 0x629   :  { %v4371_v55 = vsub.f32 %v4282_v35, %v4291_v44  ;;  %v10340_v40 = vpack.c.bf16 %v4294_v28, %v4291_v44  ;;  %v4855_v61 = vsub.f32 %v4853_v15, %v4854_v39  ;;  %v5232_v44 = vsel %vm4783_vm8, %v4775_v30, 0 }
 0x62a   :  { %10332 = vmatpush3.bf16.msra.mxu1 %v11544_v13  ;;  %v4378_v13 = vsub.f32 %v4283_v1, %v4294_v28  ;;  %v5300_v28 = vand.u32 4294901760, %v5232_v44 }
 0x62b   :  { %10333 = vmatprep.subr.bf16.mxu1 %v10785_v58  ;;  %v4372_v57 = vand.u32 4294901760, %v4371_v55  ;;  %v4856_v10 = vand.u32 4294901760, %v4855_v61 }
 0x62c   :  { %v4379_v38 = vand.u32 4294901760, %v4378_v13  ;;  %v10352_v60 = vpack.c.bf16 %v4378_v13, %v4371_v55 }
 0x62d   :  { %v4373_v43 = vsub.f32 %v4371_v55, %v4372_v57 }
 0x62e   :  { %10335 = vmatpush3.bf16.msra.mxu1 %v11548_v12  ;;  %v4380_v12 = vsub.f32 %v4378_v13, %v4379_v38  ;;  %v10364_v49 = vpack.c.bf16 %v4379_v38, %v4372_v57  ;;  %v5301_v13 = vsub.f32 %v5232_v44, %v5300_v28 }
 0x62f   :  { %10336 = vmatprep.subr.bf16.mxu1 %v10785_v58  ;;  %v4374_v62 = vand.u32 4294901760, %v4373_v43 }
 0x630   :  { %v4381_v16 = vand.u32 4294901760, %v4380_v12  ;;  %v5302_v38 = vand.u32 4294901760, %v5301_v13 }
 0x632   :  { %10338 = vmatpush3.bf16.msra.mxu1 %v11562_v32  ;;  %v10346_v53 = vpack.c.bf16 %v4381_v16, %v4374_v62  ;;  %v4284_v32 = vld [vmem:[#allocation2 + $0x240] sm:$0xff]  ;;  %v5303_v12 = vsub.f32 %v5301_v13, %v5302_v38 }
 0x633   :  { %10339 = vmatprep.subr.bf16.mxu1 %v10785_v58  ;;  %v4297_v18 = vand.u32 4294901760, %v4284_v32 }
 0x634   :  { %10347 = vmatpush3.bf16.msra.mxu0 %v10346_v53  ;;  %v5304_v16 = vand.u32 4294901760, %v5303_v12 }
 0x635   :  { %9527 = vmatmul.mubr.f32.vlgmr.msra.gmra.mrb[4].mxu1 %v3813_v29  ;;  %10348 = vmatprep.subr.bf16.mxu0 %v10785_v58  ;;  %v4385_v6 = vsub.f32 %v4284_v32, %v4297_v18  ;;  %v10343_v41 = vpack.c.bf16 %v4300_v2, %v4297_v18  ;;  %v4776_v32 = vld [vmem:[#allocation2 + $0x270] sm:$0xf] }
 0x636   :  { %9537 = vmatprep.mubr.msk.f32.mxu1 %vm10786_vm3, %v10783_v0  ;;  %10341 = vmatpush3.bf16.msra.mxu1 %v10340_v40  ;;  %v5684_v17 = vsel %vm4783_vm8, %v4776_v32, 0 }
 0x637   :  { %v4386_v5 = vand.u32 4294901760, %v4385_v6  ;;  %10342 = vmatprep.subr.bf16.mxu1 %v10785_v58  ;;  %v10355_v42 = vpack.c.bf16 %v4392_v3, %v4385_v6  ;;  %v5752_v2 = vand.u32 4294901760, %v5684_v17 }
 0x639   :  { %v4387_v8 = vsub.f32 %v4385_v6, %v4386_v5  ;;  %v10367_v48 = vpack.c.bf16 %v4393_v7, %v4386_v5  ;;  %v5753_v3 = vsub.f32 %v5684_v17, %v5752_v2 }
 0x63a   :  { %10344 = vmatpush3.bf16.msra.mxu1 %v10343_v41 }
 0x63b   :  { %v4388_v23 = vand.u32 4294901760, %v4387_v8  ;;  %10375 = vmatprep.subr.bf16.mxu1 %v10785_v58  ;;  %v5754_v7 = vand.u32 4294901760, %v5753_v3 }
 0x63d   :  { %v10349_v26 = vpack.c.bf16 %v4395_v11, %v4388_v23  ;;  %v5755_v27 = vsub.f32 %v5753_v3, %v5754_v7 }
 0x63f   :  { %10350 = vmatpush3.bf16.msra.mxu0 %v10349_v26  ;;  %v5756_v11 = vand.u32 4294901760, %v5755_v27 }
 0x640   :  { %10351 = vmatprep.subr.bf16.mxu0 %v10785_v58 }
 0x708   :  { %v4273_v25 = vpop.f32.mrb[4].mxu1 }
 0x709   :  { %4278 = vrot.lane.b32.xlu1 %v4273_v25, %s10787_s8  ;;  %v9528_v47 = vpop.f32.mrb[5].mxu1 }
 0x77b   :  { %v4279_v50 = vpop.permute.xlu1 %4278 }
 0x77c   :  { %v4281_v52 = vmax.f32 %v4273_v25, %v4279_v50 }
 0x77e   :  { %v4288_v59 = vsel %vm4286_vm7, %v4281_v52, 0 }
 0x77f   :  { %v4359_v63 = vand.u32 4294901760, %v4288_v59 }
 0x781   :  { %v4360_v4 = vsub.f32 %v4288_v59, %v4359_v63  ;;  %9549 = vmatmul.mubr.f32.vlgmr.msra.gmra.mrb[12].mxu0 %v4359_v63 }
 0x782   :  { %10353 = vmatpush3.bf16.msra.mxu0 %v10352_v60  ;;  %9559 = vmatprep.mubr.msk.f32.mxu0 %vm10786_vm3, %v10783_v0 }
 0x783   :  { %v4361_v36 = vand.u32 4294901760, %v4360_v4  ;;  %10354 = vmatprep.subr.bf16.mxu0 %v10785_v58 }
 0x785   :  { %v4362_v22 = vsub.f32 %v4360_v4, %v4361_v36 }
 0x786   :  { %10356 = vmatpush3.bf16.msra.mxu0 %v10355_v42  ;;  %v6152_v42 = vld [vmem:[#allocation2 + $0x2a0] sm:$0xff] }
 0x787   :  { %v4363_v21 = vand.u32 4294901760, %v4362_v22  ;;  %10357 = vmatprep.subr.bf16.mxu0 %v10785_v58  ;;  %v6164_v50 = vand.u32 4294901760, %v6152_v42 }
 0x789   :  { %9538 = vmatmul.mubr.f32.vlgmr.msra.gmra.mrb[6].mxu1 %v4363_v21  ;;  %9560 = vmatmul.mubr.f32.vlgmr.msra.gmra.mrb[12].mxu0 %v4360_v4  ;;  %v6252_v4 = vsub.f32 %v6152_v42, %v6164_v50 }
 0x78a   :  { %10359 = vmatpush3.bf16.msra.mxu0 %v10340_v40  ;;  %9570 = vmatprep.mubr.msk.f32.mxu0 %vm10786_vm3, %v10783_v0 }
 0x78b   :  { %10360 = vmatprep.subr.bf16.mxu0 %v10785_v58  ;;  %9693 = vmatprep.mubr.msk.f32.mxu1 %vm10786_vm3, %v10783_v0 }
 0x78e   :  { %10362 = vmatpush3.bf16.msra.mxu0 %v10343_v41 }
 0x78f   :  { %10363 = vmatprep.subr.bf16.mxu0 %v10785_v58 }
 0x791   :  { %9571 = vmatmul.mubr.f32.vlgmr.msra.gmra.mrb[12].mxu0 %v4361_v36 }
 0x792   :  { %10365 = vmatpush3.bf16.msra.mxu0 %v10364_v49  ;;  %9581 = vmatprep.mubr.msk.f32.mxu0 %vm10786_vm3, %v10783_v0 }
 0x793   :  { %10366 = vmatprep.subr.bf16.mxu0 %v10785_v58 }
 0x796   :  { %10368 = vmatpush3.bf16.msra.mxu0 %v10367_v48  ;;  %v6153_v48 = vld [vmem:[#allocation2 + $0x2b0] sm:$0xff] }
 0x797   :  { %10369 = vmatprep.subr.bf16.mxu0 %v10785_v58  ;;  %v6167_v52 = vand.u32 4294901760, %v6153_v48 }
 0x799   :  { %9582 = vmatmul.mubr.f32.vlgmr.msra.gmra.mrb[12].mxu0 %v4359_v63  ;;  %v6259_v36 = vsub.f32 %v6153_v48, %v6167_v52  ;;  %v11721_v22 = vpack.c.bf16 %v6167_v52, %v6164_v50  ;;  %v6642_v52 = vld [vmem:[#allocation2 + $0x2c0] sm:$0x3] }
 0x79a   :  { %10371 = vmatpush3.bf16.msra.mxu0 %v10340_v40  ;;  %9592 = vmatprep.mubr.msk.f32.mxu0 %vm10786_vm3, %v10783_v0  ;;  %v6150_v40 = vld [vmem:[#allocation2 + $0x280] sm:$0xff] }
 0x79b   :  { %10372 = vmatprep.subr.bf16.mxu0 %v10785_v58  ;;  %v6158_v25 = vand.u32 4294901760, %v6150_v40  ;;  %v6260_v30 = vand.u32 4294901760, %v6259_v36 }
 0x79d   :  { %v6238_v60 = vsub.f32 %v6150_v40, %v6158_v25 }
 0x79e   :  { %10374 = vmatpush3.bf16.msra.mxu0 %v10343_v41  ;;  %v6151_v41 = vld [vmem:[#allocation2 + $0x290] sm:$0xff] }
 0x79f   :  { %9595 = vmatprep.subr.mxu0 %v10783_v0  ;;  %v6161_v47 = vand.u32 4294901760, %v6151_v41  ;;  %v6239_v21 = vand.u32 4294901760, %v6238_v60 }
 0x7a1   :  { %9593 = vmatmul.mubr.f32.vlgmr.msra.gmra.mrb[12].mxu0 %v4359_v63  ;;  %v11718_v59 = vpack.c.bf16 %v6161_v47, %v6158_v25  ;;  %v6245_v63 = vsub.f32 %v6151_v41, %v6161_v47  ;;  %v6671_v47 = vld [vmem:[#allocation2 + $0x2d0] sm:$0xf] }
 0x7a2   :  { %9597 = vmatprep.mubr.msk.f32.mxu0 %vm10786_vm3, %v10783_v0  ;;  %v6674_v48 = vsel %vm6672_vm10, %v6671_v47, 0 }
 0x7a3   :  { %10377 = vmatpush3.bf16.msra.mxu1 %v11718_v59  ;;  %v6246_v49 = vand.u32 4294901760, %v6245_v63 }
 0x7a4   :  { %10378 = vmatprep.subr.bf16.mxu1 %v10785_v58 }
 0x7a7   :  { %10380 = vmatpush3.bf16.msra.mxu1 %v11721_v22 }
 0x7a8   :  { %10381 = vmatprep.subr.bf16.mxu1 %v10785_v58 }
 0x85c   :  { %v4365_v56 = vpop.f32.mrb[6].mxu1 }
 0x85d   :  { %v9539_v34 = vpop.f32.mrb[7].mxu1 }
 0x85e   :  { %v6247_v34 = vsub.f32 %v6245_v63, %v6246_v49 }
 0x874   :  { %v4771_v9 = vpop.f32.mrb[12].mxu0 }
 0x875   :  { %v10483_v31 = vadd.f32 %v4771_v9, %v4365_v56  ;;  %v9594_v45 = vpop.f32.mrb[13].mxu0  ;;  %v6240_v56 = vsub.f32 %v6238_v60, %v6239_v21 }
 0x876   :  { %v6253_v45 = vand.u32 4294901760, %v6252_v4 }
 0x877   :  { %5680 = vrot.lane.b32.xlu1 %v10483_v31, %s10784_s0  ;;  %4780 = vrot.lane.b32.xlu0 %v10483_v31, %s10787_s8  ;;  %v5235_v55 = vand.u32 4294901760, %v10483_v31  ;;  %v6241_v9 = vand.u32 4294901760, %v6240_v56 }
 0x878   :  { %v6254_v54 = vsub.f32 %v6252_v4, %v6253_v45 }
 0x879   :  { %v5312_v57 = vsub.f32 %v10483_v31, %v5235_v55  ;;  %v6248_v31 = vand.u32 4294901760, %v6247_v34 }
 0x87b   :  { %v5313_v43 = vand.u32 4294901760, %v5312_v57  ;;  %v10382_v33 = vpack.c.bf16 %v6248_v31, %v6241_v9 }
 0x87d   :  { %v5314_v62 = vsub.f32 %v5312_v57, %v5313_v43 }
 0x87f   :  { %v5315_v53 = vand.u32 4294901760, %v5314_v62 }
 0x8e9   :  { %v4781_v29 = vpop.permute.xlu0 %4780  ;;  %v5681_v18 = vpop.permute.xlu1 %5680 }
 0x8ea   :  { %v4787_v14 = vand.u32 4294901760, %v4781_v29  ;;  %v5687_v6 = vand.u32 4294901760, %v5681_v18 }
 0x8ec   :  { %v4864_v20 = vsub.f32 %v4781_v29, %v4787_v14  ;;  %9596 = vmatpush3.msra.mxu0 %v4787_v14  ;;  %v5764_v5 = vsub.f32 %v5681_v18, %v5687_v6  ;;  %v10388_v29 = vpack.c.bf16 %v6245_v63, %v6238_v60  ;;  %v6745_v60 = vand.u32 4294901760, %v6674_v48 }
 0x8ed   :  { %9598 = vmatmul.mubr.f32.vlgmr.msra.gmra.mrb[14].mxu0 %v4856_v10  ;;  %9600 = vmatprep.subr.mxu0 %v10783_v0  ;;  %v10391_v10 = vpack.c.bf16 %v6259_v36, %v6252_v4 }
 0x8ee   :  { %v4865_v51 = vand.u32 4294901760, %v4864_v20  ;;  %9602 = vmatprep.mubr.msk.f32.mxu0 %vm10786_vm3, %v10783_v0  ;;  %v5765_v8 = vand.u32 4294901760, %v5764_v5 }
 0x8f0   :  { %v4866_v35 = vsub.f32 %v4864_v20, %v4865_v51  ;;  %v5766_v23 = vsub.f32 %v5764_v5, %v5765_v8 }
 0x8f2   :  { %v4867_v1 = vand.u32 4294901760, %v4866_v35  ;;  %v5767_v26 = vand.u32 4294901760, %v5766_v23 }
 0x8f4   :  { %9601 = vmatpush3.msra.mxu0 %v4867_v1 }
 0x8f5   :  { %9603 = vmatmul.mubr.f32.vlgmr.msra.gmra.mrb[14].mxu0 %v4852_v46  ;;  %9605 = vmatprep.subr.mxu0 %v10783_v0 }
 0x8f6   :  { %9606 = vmatpush3.msra.mxu0 %v4864_v20  ;;  %9607 = vmatprep.mubr.msk.f32.mxu0 %vm10786_vm3, %v10783_v0  ;;  %v10403_v20 = vpack.c.bf16 %v6260_v30, %v6253_v45 }
 0x8f7   :  { %9610 = vmatprep.subr.mxu0 %v10783_v0 }
 0x8fd   :  { %9608 = vmatmul.mubr.f32.vlgmr.msra.gmra.mrb[14].mxu0 %v4853_v15  ;;  %v6255_v15 = vand.u32 4294901760, %v6254_v54 }
 0x8fe   :  { %9611 = vmatpush3.msra.mxu0 %v4787_v14  ;;  %9612 = vmatprep.mubr.msk.f32.mxu0 %vm10786_vm3, %v10783_v0 }
 0x8ff   :  { %9615 = vmatprep.subr.mxu0 %v10783_v0 }
 0x905   :  { %9613 = vmatmul.mubr.f32.vlgmr.msra.gmra.mrb[14].mxu0 %v4854_v39 }
 0x906   :  { %9616 = vmatpush3.msra.mxu0 %v4865_v51  ;;  %9617 = vmatprep.mubr.msk.f32.mxu0 %vm10786_vm3, %v10783_v0 }
 0x907   :  { %9620 = vmatprep.subr.mxu0 %v10783_v0 }
 0x90d   :  { %9618 = vmatmul.mubr.f32.vlgmr.msra.gmra.mrb[14].mxu0 %v4852_v46 }
 0x90e   :  { %9621 = vmatpush3.msra.mxu0 %v4787_v14  ;;  %9622 = vmatprep.mubr.msk.f32.mxu0 %vm10786_vm3, %v10783_v0  ;;  %v10400_v14 = vpack.c.bf16 %v6246_v49, %v6239_v21 }
 0x90f   :  { %9625 = vmatprep.subr.mxu0 %v10783_v0 }
 0x915   :  { %9623 = vmatmul.mubr.f32.vlgmr.msra.gmra.mrb[14].mxu0 %v4852_v46  ;;  %v6261_v46 = vsub.f32 %v6259_v36, %v6260_v30 }
 0x916   :  { %9626 = vmatpush3.msra.mxu0 %v5235_v55  ;;  %9627 = vmatprep.mubr.msk.f32.mxu0 %vm10786_vm3, %v10783_v0 }
 0x917   :  { %9630 = vmatprep.subr.mxu0 %v10783_v0  ;;  %v6262_v39 = vand.u32 4294901760, %v6261_v46 }
 0x919   :  { %v10385_v61 = vpack.c.bf16 %v6262_v39, %v6255_v15 }
 0x91d   :  { %9628 = vmatmul.mubr.f32.vlgmr.msra.gmra.mrb[14].mxu0 %v5304_v16 }
 0x91e   :  { %9631 = vmatpush3.msra.mxu0 %v5315_v53  ;;  %9632 = vmatprep.mubr.msk.f32.mxu0 %vm10786_vm3, %v10783_v0 }
 0x91f   :  { %9635 = vmatprep.subr.mxu0 %v10783_v0 }
 0x925   :  { %9633 = vmatmul.mubr.f32.vlgmr.msra.gmra.mrb[14].mxu0 %v5300_v28 }
 0x926   :  { %9636 = vmatpush3.msra.mxu0 %v5312_v57  ;;  %9637 = vmatprep.mubr.msk.f32.mxu0 %vm10786_vm3, %v10783_v0 }
 0x927   :  { %9640 = vmatprep.subr.mxu0 %v10783_v0 }
 0x92d   :  { %9638 = vmatmul.mubr.f32.vlgmr.msra.gmra.mrb[14].mxu0 %v5301_v13 }
 0x92e   :  { %9641 = vmatpush3.msra.mxu0 %v5235_v55  ;;  %9642 = vmatprep.mubr.msk.f32.mxu0 %vm10786_vm3, %v10783_v0 }
 0x92f   :  { %9645 = vmatprep.subr.mxu0 %v10783_v0 }
 0x935   :  { %9643 = vmatmul.mubr.f32.vlgmr.msra.gmra.mrb[14].mxu0 %v5302_v38 }
 0x936   :  { %9646 = vmatpush3.msra.mxu0 %v5313_v43  ;;  %9647 = vmatprep.mubr.msk.f32.mxu0 %vm10786_vm3, %v10783_v0 }
 0x937   :  { %9650 = vmatprep.subr.mxu0 %v10783_v0 }
 0x93d   :  { %9648 = vmatmul.mubr.f32.vlgmr.msra.gmra.mrb[14].mxu0 %v5300_v28 }
 0x93e   :  { %9651 = vmatpush3.msra.mxu0 %v5235_v55  ;;  %9652 = vmatprep.mubr.msk.f32.mxu0 %vm10786_vm3, %v10783_v0 }
 0x93f   :  { %9655 = vmatprep.subr.mxu0 %v10783_v0 }
 0x945   :  { %9653 = vmatmul.mubr.f32.vlgmr.msra.gmra.mrb[14].mxu0 %v5300_v28 }
 0x946   :  { %9656 = vmatpush3.msra.mxu0 %v5687_v6  ;;  %9657 = vmatprep.mubr.msk.f32.mxu0 %vm10786_vm3, %v10783_v0 }
 0x947   :  { %9660 = vmatprep.subr.mxu0 %v10783_v0 }
 0x94d   :  { %9658 = vmatmul.mubr.f32.vlgmr.msra.gmra.mrb[14].mxu0 %v5756_v11 }
 0x94e   :  { %9661 = vmatpush3.msra.mxu0 %v5767_v26  ;;  %9662 = vmatprep.mubr.msk.f32.mxu0 %vm10786_vm3, %v10783_v0 }
 0x94f   :  { %9665 = vmatprep.subr.mxu0 %v10783_v0 }
 0x955   :  { %9663 = vmatmul.mubr.f32.vlgmr.msra.gmra.mrb[14].mxu0 %v5752_v2 }
 0x956   :  { %9666 = vmatpush3.msra.mxu0 %v5764_v5  ;;  %9667 = vmatprep.mubr.msk.f32.mxu0 %vm10786_vm3, %v10783_v0 }
 0x957   :  { %9670 = vmatprep.subr.mxu0 %v10783_v0 }
 0x95d   :  { %9668 = vmatmul.mubr.f32.vlgmr.msra.gmra.mrb[14].mxu0 %v5753_v3 }
 0x95e   :  { %9671 = vmatpush3.msra.mxu0 %v5687_v6  ;;  %9672 = vmatprep.mubr.msk.f32.mxu0 %vm10786_vm3, %v10783_v0 }
 0x95f   :  { %9675 = vmatprep.subr.mxu0 %v10783_v0 }
 0x965   :  { %9673 = vmatmul.mubr.f32.vlgmr.msra.gmra.mrb[14].mxu0 %v5754_v7 }
 0x966   :  { %9676 = vmatpush3.msra.mxu0 %v5765_v8  ;;  %9677 = vmatprep.mubr.msk.f32.mxu0 %vm10786_vm3, %v10783_v0 }
 0x967   :  { %9680 = vmatprep.subr.mxu0 %v10783_v0 }
 0x96d   :  { %9678 = vmatmul.mubr.f32.vlgmr.msra.gmra.mrb[14].mxu0 %v5752_v2 }
 0x96e   :  { %9681 = vmatpush3.msra.mxu0 %v5687_v6  ;;  %9682 = vmatprep.mubr.msk.f32.mxu0 %vm10786_vm3, %v10783_v0 }
 0x96f   :  { %9751 = vmatprep.subr.mxu0 %v10783_v0 }
 0x975   :  { %9683 = vmatmul.mubr.f32.vlgmr.msra.gmra.mrb[14].mxu0 %v5752_v2 }
 0x976   :  { %9753 = vmatprep.mubr.msk.f32.mxu0 %vm10786_vm3, %v10783_v0 }
 0xa48   :  { %v11726_v51 = vpop.f32.mrb[14].mxu0 }
 0xa49   :  { %v6134_v35 = vsel %vm6133_vm9, %v11726_v51, 0.0  ;;  %v6141_v1 = vmul.f32 %v11726_v51, %v11726_v51  ;;  %v9684_v44 = vpop.f32.mrb[15].mxu0 }
 0xa4a   :  { %v6135_v28 = vrot.slane %v6134_v35, 4 }
 0xa4b   :  { %v6142_v55 = vsel %vm6133_vm9, %v6141_v1, 0.0 }
 0xa4c   :  { %v6136_v13 = vadd.f32 %v6135_v28, %v6134_v35  ;;  %v6143_v57 = vrot.slane %v6142_v55, 4 }
 0xa4e   :  { %v6137_v38 = vrot.slane %v6136_v13, 2  ;;  %v6144_v43 = vadd.f32 %v6143_v57, %v6142_v55 }
 0xa50   :  { %v6138_v12 = vadd.f32 %v6137_v38, %v6136_v13  ;;  %v6145_v62 = vrot.slane %v6144_v43, 2 }
 0xa52   :  { %v6139_v16 = vrot.slane %v6138_v12, 1  ;;  %v6146_v53 = vadd.f32 %v6145_v62, %v6144_v43 }
 0xa54   :  { %v6147_v32 = vrot.slane %v6146_v53, 1  ;;  %v6140_v17 = vadd.f32 %v6139_v16, %v6138_v12 }
 0xa56   :  { %v6148_v18 = vadd.f32 %v6147_v32, %v6146_v53 }
 0xa58   :  { %v6149_v2 = vsel %vm2635_vm5, %v6140_v17, %v6148_v18 }
 0xa59   :  { %v6155_v6 = vsel %vm4286_vm7, %v6149_v2, 0 }
 0xa5a   :  { %v6226_v3 = vand.u32 4294901760, %v6155_v6 }
 0xa5c   :  { %v6227_v5 = vsub.f32 %v6155_v6, %v6226_v3 }
 0xa5e   :  { %v6228_v7 = vand.u32 4294901760, %v6227_v5 }
 0xa60   :  { %v6229_v8 = vsub.f32 %v6227_v5, %v6228_v7 }
 0xa62   :  { %v6230_v27 = vand.u32 4294901760, %v6229_v8  ;;  %v7600_v8 = vld [vmem:[#allocation2 + $0x310] sm:$0xff] }
 0xa64   :  { %9694 = vmatmul.mubr.f32.vlgmr.msra.gmra.mrb[8].mxu1 %v6230_v27  ;;  %v7601_v27 = vld [vmem:[#allocation2 + $0x320] sm:$0xff] }
 0xa65   :  { %10383 = vmatpush3.bf16.msra.mxu1 %v10382_v33  ;;  %9704 = vmatprep.mubr.msk.f32.mxu1 %vm10786_vm3, %v10783_v0 }
 0xa66   :  { %10384 = vmatprep.subr.bf16.mxu1 %v10785_v58 }
 0xa69   :  { %10386 = vmatpush3.bf16.msra.mxu1 %v10385_v61 }
 0xa6a   :  { %10387 = vmatprep.subr.bf16.mxu1 %v10785_v58 }
 0xa6c   :  { %9705 = vmatmul.mubr.f32.vlgmr.msra.gmra.mrb[8].mxu1 %v6226_v3 }
 0xa6d   :  { %10389 = vmatpush3.bf16.msra.mxu1 %v10388_v29  ;;  %9715 = vmatprep.mubr.msk.f32.mxu1 %vm10786_vm3, %v10783_v0  ;;  %v7141_v29 = vand.u32 4294901760, %v7134_v37 }
 0xa6e   :  { %10390 = vmatprep.subr.bf16.mxu1 %v10785_v58 }
 0xa6f   :  { %v7219_v1 = vsub.f32 %v7134_v37, %v7141_v29 }
 0xa71   :  { %10392 = vmatpush3.bf16.msra.mxu1 %v10391_v10  ;;  %v7220_v55 = vand.u32 4294901760, %v7219_v1 }
 0xa72   :  { %10393 = vmatprep.subr.bf16.mxu1 %v10785_v58 }
 0xa73   :  { %v7221_v57 = vsub.f32 %v7219_v1, %v7220_v55 }
 0xa74   :  { %9716 = vmatmul.mubr.f32.vlgmr.msra.gmra.mrb[8].mxu1 %v6227_v5 }
 0xa75   :  { %10395 = vmatpush3.bf16.msra.mxu1 %v11718_v59  ;;  %9726 = vmatprep.mubr.msk.f32.mxu1 %vm10786_vm3, %v10783_v0  ;;  %v7222_v43 = vand.u32 4294901760, %v7221_v57 }
 0xa76   :  { %10396 = vmatprep.subr.bf16.mxu1 %v10785_v58 }
 0xa79   :  { %10398 = vmatpush3.bf16.msra.mxu1 %v11721_v22 }
 0xa7a   :  { %10399 = vmatprep.subr.bf16.mxu1 %v10785_v58 }
 0xa7c   :  { %9727 = vmatmul.mubr.f32.vlgmr.msra.gmra.mrb[8].mxu1 %v6228_v7 }
 0xa7d   :  { %10401 = vmatpush3.bf16.msra.mxu1 %v10400_v14  ;;  %9737 = vmatprep.mubr.msk.f32.mxu1 %vm10786_vm3, %v10783_v0 }
 0xa7e   :  { %10402 = vmatprep.subr.bf16.mxu1 %v10785_v58 }
 0xa81   :  { %10404 = vmatpush3.bf16.msra.mxu1 %v10403_v20 }
 0xa82   :  { %10405 = vmatprep.subr.bf16.mxu1 %v10785_v58 }
 0xa84   :  { %9738 = vmatmul.mubr.f32.vlgmr.msra.gmra.mrb[8].mxu1 %v6226_v3 }
 0xa85   :  { %10407 = vmatpush3.bf16.msra.mxu1 %v11718_v59  ;;  %9748 = vmatprep.mubr.msk.f32.mxu1 %vm10786_vm3, %v10783_v0 }
 0xa86   :  { %10408 = vmatprep.subr.bf16.mxu1 %v10785_v58 }
 0xa89   :  { %10410 = vmatpush3.bf16.msra.mxu1 %v11721_v22  ;;  %v6746_v22 = vsub.f32 %v6674_v48, %v6745_v60 }
 0xa8a   :  { %10411 = vmatprep.subr.bf16.mxu1 %v10785_v58 }
 0xa8b   :  { %v6747_v34 = vand.u32 4294901760, %v6746_v22 }
 0xa8c   :  { %9749 = vmatmul.mubr.f32.vlgmr.msra.gmra.mrb[8].mxu1 %v6226_v3 }
 0xa8d   :  { %9785 = vmatprep.mubr.msk.f32.mxu1 %vm10786_vm3, %v10783_v0  ;;  %v6748_v45 = vsub.f32 %v6746_v22, %v6747_v34 }
 0xa8f   :  { %v6749_v54 = vand.u32 4294901760, %v6748_v45 }
 0xb5f   :  { %v6638_v23 = vpop.f32.mrb[8].mxu1 }
 0xb60   :  { %v6643_v11 = vmul.f32 0.125, %v6638_v23  ;;  %v9750_v26 = vpop.f32.mrb[9].mxu1  ;;  %v7609_v23 = vand.u32 4294901760, %v7600_v8 }
 0xb62   :  { %v6644_v40 = vmul.f32 %v6643_v11, %v6643_v11 }
 0xb64   :  { %v6646_v41 = vrot.slane %v6644_v40, 7  ;;  %v7689_v40 = vsub.f32 %v7600_v8, %v7609_v23 }
 0xb66   :  { %v6648_v42 = vsub.f32 %v6643_v11, %v6646_v41 }
 0xb68   :  { %v6649_v25 = vadd.f32 1e-05, %v6648_v42  ;;  %v7602_v42 = vld [vmem:[#allocation2 + $0x330] sm:$0xff] }
 0xb69   :  { %v7615_v47 = vand.u32 4294901760, %v7602_v42 }
 0xb6a   :  { %10706 = vrsqrt.f32 %v6649_v25  ;;  %v7603_v25 = vld [vmem:[#allocation2 + $0x340] sm:$0xff] }
 0xb6b   :  { %v7618_v48 = vand.u32 4294901760, %v7603_v25 }
 0xb74   :  { %v10707_v50 = vpop.eup %10706 }
 0xb75   :  { %v6652_v59 = vrot.slane %v10707_v50, 1  ;;  %v7690_v50 = vand.u32 4294901760, %v7689_v40 }
 0xb77   :  { %v6654_v63 = vmul.f32 %v6652_v59, %v6642_v52  ;;  %v10433_v59 = vpack.c.bf16 %v7618_v48, %v7615_v47 }
 0xb79   :  { %v6655_v4 = vmul.f32 %v6654_v63, %v6643_v11  ;;  %v6663_v36 = vrot.slane %v6654_v63, %v3205_v24  ;;  %v7612_v11 = vand.u32 4294901760, %v7601_v27  ;;  %v7710_v63 = vsub.f32 %v7603_v25, %v7618_v48 }
 0xb7b   :  { %v6657_v21 = vrot.slane %v6655_v4, 7  ;;  %v6664_v49 = vmul.f32 %v6663_v36, %v11726_v51  ;;  %v11802_v26 = vpack.c.bf16 %v7612_v11, %v7609_v23  ;;  %v7696_v41 = vsub.f32 %v7601_v27, %v7612_v11 }
 0xb7c   :  { %v7691_v4 = vsub.f32 %v7689_v40, %v7690_v50 }
 0xb7d   :  { %v6659_v56 = vsub.f32 %v6642_v52, %v6657_v21  ;;  %v7697_v52 = vand.u32 4294901760, %v7696_v41 }
 0xb7f   :  { %v6668_v9 = vrot.slane %v6659_v56, %v3211_v19  ;;  %v7135_v19 = vld [vmem:[#allocation2 + $0x2f0] sm:$0xff]  ;;  %v7698_v36 = vsub.f32 %v7696_v41, %v7697_v52 }
 0xb80   :  { %v7144_v10 = vand.u32 4294901760, %v7135_v19 }
 0xb81   :  { %v6669_v31 = vadd.f32 %v6668_v9, %v6664_v49  ;;  %v7711_v49 = vand.u32 4294901760, %v7710_v63  ;;  %v7699_v56 = vand.u32 4294901760, %v7698_v36 }
 0xb82   :  { %v10412_v35 = vpack.c.bf16 %v7144_v10, %v7141_v29  ;;  %v7226_v44 = vsub.f32 %v7135_v19, %v7144_v10 }
 0xb83   :  { %v6670_v30 = vmax.f32 %v6669_v31, 0.0  ;;  %v7712_v9 = vsub.f32 %v7710_v63, %v7711_v49 }
 0xb84   :  { %10413 = vmatpush3.bf16.msra.mxu1 %v10412_v35  ;;  %v7227_v13 = vand.u32 4294901760, %v7226_v44  ;;  %v10418_v16 = vpack.c.bf16 %v7226_v44, %v7219_v1 }
 0xb85   :  { %v6677_v33 = vsel %vm969_vm2, %v6670_v30, 0  ;;  %10414 = vmatprep.subr.bf16.mxu1 %v10785_v58  ;;  %v7713_v30 = vand.u32 4294901760, %v7712_v9 }
 0xb86   :  { %v6680_v46 = vand.u32 4294901760, %v6677_v33  ;;  %v7228_v38 = vsub.f32 %v7226_v44, %v7227_v13  ;;  %v10424_v53 = vpack.c.bf16 %v7227_v13, %v7220_v55  ;;  %v8094_v44 = vld [vmem:[#allocation2 + $0x360] sm:$0xff] }
 0xb87   :  { %v8101_v55 = vand.u32 4294901760, %v8094_v44 }
 0xb88   :  { %9752 = vmatpush3.msra.mxu0 %v6680_v46  ;;  %v6757_v15 = vsub.f32 %v6677_v33, %v6680_v46  ;;  %v7229_v12 = vand.u32 4294901760, %v7228_v38 }
 0xb89   :  { %9754 = vmatmul.mubr.f32.vlgmr.msra.gmra.mrb[16].mxu0 %v6749_v54  ;;  %9756 = vmatprep.subr.mxu0 %v10783_v0  ;;  %v10442_v54 = vpack.c.bf16 %v7696_v41, %v7689_v40  ;;  %v8179_v38 = vsub.f32 %v8094_v44, %v8101_v55 }
 0xb8a   :  { %v6758_v24 = vand.u32 4294901760, %v6757_v15  ;;  %9758 = vmatprep.mubr.msk.f32.mxu0 %vm10786_vm3, %v10783_v0  ;;  %v10415_v62 = vpack.c.bf16 %v7229_v12, %v7222_v43 }
 0xb8b   :  { %v8180_v12 = vand.u32 4294901760, %v8179_v38 }
 0xb8c   :  { %v6759_v39 = vsub.f32 %v6757_v15, %v6758_v24 }
 0xb8e   :  { %v6760_v61 = vand.u32 4294901760, %v6759_v39  ;;  %v7136_v39 = vld [vmem:[#allocation2 + $0x300] ss:$0 sm:$0xff] }
 0xb90   :  { %9757 = vmatpush3.msra.mxu0 %v6760_v61 }
 0xb91   :  { %9759 = vmatmul.mubr.f32.vlgmr.msra.gmra.mrb[16].mxu0 %v6745_v60  ;;  %9761 = vmatprep.subr.mxu0 %v10783_v0 }
 0xb92   :  { %9762 = vmatpush3.msra.mxu0 %v6757_v15  ;;  %9763 = vmatprep.mubr.msk.f32.mxu0 %vm10786_vm3, %v10783_v0  ;;  %v10454_v15 = vpack.c.bf16 %v7697_v52, %v7690_v50 }
 0xb93   :  { %9766 = vmatprep.subr.mxu0 %v10783_v0 }
 0xb99   :  { %9764 = vmatmul.mubr.f32.vlgmr.msra.gmra.mrb[16].mxu0 %v6746_v22  ;;  %v7692_v22 = vand.u32 4294901760, %v7691_v4 }
 0xb9a   :  { %9767 = vmatpush3.msra.mxu0 %v6680_v46  ;;  %9768 = vmatprep.mubr.msk.f32.mxu0 %vm10786_vm3, %v10783_v0 }
 0xb9b   :  { %9771 = vmatprep.subr.mxu0 %v10783_v0  ;;  %v10436_v31 = vpack.c.bf16 %v7699_v56, %v7692_v22 }
 0xba1   :  { %9769 = vmatmul.mubr.f32.vlgmr.msra.gmra.mrb[16].mxu0 %v6747_v34 }
 0xba2   :  { %9772 = vmatpush3.msra.mxu0 %v6758_v24  ;;  %9773 = vmatprep.mubr.msk.f32.mxu0 %vm10786_vm3, %v10783_v0 }
 0xba3   :  { %9776 = vmatprep.subr.mxu0 %v10783_v0 }
 0xba9   :  { %9774 = vmatmul.mubr.f32.vlgmr.msra.gmra.mrb[16].mxu0 %v6745_v60 }
 0xbaa   :  { %9777 = vmatpush3.msra.mxu0 %v6680_v46  ;;  %9778 = vmatprep.mubr.msk.f32.mxu0 %vm10786_vm3, %v10783_v0 }
 0xbab   :  { %10429 = vmatprep.subr.bf16.mxu0 %v10785_v58 }
 0xbb1   :  { %9779 = vmatmul.mubr.f32.vlgmr.msra.gmra.mrb[16].mxu0 %v6745_v60  ;;  %v7703_v60 = vsub.f32 %v7602_v42, %v7615_v47 }
 0xbb2   :  { %9831 = vmatprep.mubr.msk.f32.mxu0 %vm10786_vm3, %v10783_v0  ;;  %10431 = vmatpush3.bf16.msra.mxu0 %v11802_v26 }
 0xbb3   :  { %10432 = vmatprep.subr.bf16.mxu0 %v10785_v58  ;;  %v7704_v21 = vand.u32 4294901760, %v7703_v60  ;;  %v10445_v46 = vpack.c.bf16 %v7710_v63, %v7703_v60 }
 0xbb5   :  { %v7705_v34 = vsub.f32 %v7703_v60, %v7704_v21  ;;  %v10457_v24 = vpack.c.bf16 %v7711_v49, %v7704_v21 }
 0xbb6   :  { %10434 = vmatpush3.bf16.msra.mxu0 %v10433_v59 }
 0xbb7   :  { %10435 = vmatprep.subr.bf16.mxu0 %v10785_v58  ;;  %v7706_v45 = vand.u32 4294901760, %v7705_v34 }
 0xbb9   :  { %v10439_v33 = vpack.c.bf16 %v7713_v30, %v7706_v45 }
 0xc84   :  { %v7121_v14 = vpop.f32.mrb[16].mxu0 }
 0xc85   :  { %v7126_v20 = vrot.slane %v7121_v14, 2  ;;  %v9780_v51 = vpop.f32.mrb[17].mxu0 }
 0xc87   :  { %v7128_v28 = vmax.f32 %v7121_v14, %v7126_v20 }
 0xc89   :  { %7130 = vrot.lane.b32.xlu0 %v7128_v28, %s10788_s9 }
 0xcfb   :  { %v7131_v32 = vpop.permute.xlu0 %7130 }
 0xcfc   :  { %v7133_v17 = vmax.f32 %v7128_v28, %v7131_v32  ;;  %v8095_v28 = vld [vmem:[#allocation2 + $0x370] sm:$0xff] }
 0xcfd   :  { %v8104_v13 = vand.u32 4294901760, %v8095_v28 }
 0xcfe   :  { %v7138_v18 = vsel %vm3219_vm6, %v7133_v17, 0 }
 0xcff   :  { %v7207_v2 = vand.u32 4294901760, %v7138_v18  ;;  %v10466_v57 = vpack.c.bf16 %v8104_v13, %v8101_v55  ;;  %v8186_v43 = vsub.f32 %v8095_v28, %v8104_v13 }
 0xd01   :  { %v7208_v6 = vsub.f32 %v7138_v18, %v7207_v2 }
 0xd03   :  { %v7209_v3 = vand.u32 4294901760, %v7208_v6 }
 0xd05   :  { %v7210_v5 = vsub.f32 %v7208_v6, %v7209_v3 }
 0xd07   :  { %v7211_v7 = vand.u32 4294901760, %v7210_v5 }
 0xd09   :  { %9786 = vmatmul.mubr.f32.vlgmr.msra.gmra.mrb[10].mxu1 %v7211_v7 }
 0xd0a   :  { %10416 = vmatpush3.bf16.msra.mxu1 %v10415_v62  ;;  %9792 = vmatprep.mubr.msk.f32.mxu1 %vm10786_vm3, %v10783_v0  ;;  %v8187_v62 = vand.u32 4294901760, %v8186_v43 }
 0xd0b   :  { %10417 = vmatprep.subr.bf16.mxu1 %v10785_v58 }
 0xd11   :  { %9793 = vmatmul.mubr.f32.vlgmr.msra.gmra.mrb[10].mxu1 %v7207_v2 }
 0xd12   :  { %10419 = vmatpush3.bf16.msra.mxu1 %v10418_v16  ;;  %9799 = vmatprep.mubr.msk.f32.mxu1 %vm10786_vm3, %v10783_v0  ;;  %v8181_v16 = vsub.f32 %v8179_v38, %v8180_v12 }
 0xd13   :  { %10420 = vmatprep.subr.bf16.mxu1 %v10785_v58 }
 0xd14   :  { %v8182_v32 = vand.u32 4294901760, %v8181_v16 }
 0xd19   :  { %9800 = vmatmul.mubr.f32.vlgmr.msra.gmra.mrb[10].mxu1 %v7208_v6  ;;  %v10478_v6 = vpack.c.bf16 %v8187_v62, %v8180_v12 }
 0xd1a   :  { %10422 = vmatpush3.bf16.msra.mxu1 %v10412_v35  ;;  %9806 = vmatprep.mubr.msk.f32.mxu1 %vm10786_vm3, %v10783_v0 }
 0xd1b   :  { %10423 = vmatprep.subr.bf16.mxu1 %v10785_v58 }
 0xd21   :  { %9807 = vmatmul.mubr.f32.vlgmr.msra.gmra.mrb[10].mxu1 %v7209_v3  ;;  %v7604_v3 = vld [vmem:[#allocation2 + $0x350] ss:$0 sm:$0xff] }
 0xd22   :  { %10425 = vmatpush3.bf16.msra.mxu1 %v10424_v53  ;;  %9813 = vmatprep.mubr.msk.f32.mxu1 %vm10786_vm3, %v10783_v0  ;;  %v8188_v53 = vsub.f32 %v8186_v43, %v8187_v62 }
 0xd23   :  { %10426 = vmatprep.subr.bf16.mxu1 %v10785_v58 }
 0xd24   :  { %v8189_v17 = vand.u32 4294901760, %v8188_v53 }
 0xd26   :  { %v10469_v18 = vpack.c.bf16 %v8189_v17, %v8182_v32 }
 0xd29   :  { %9814 = vmatmul.mubr.f32.vlgmr.msra.gmra.mrb[10].mxu1 %v7207_v2 }
 0xd2a   :  { %10428 = vmatpush3.bf16.msra.mxu1 %v10412_v35  ;;  %9820 = vmatprep.mubr.msk.f32.mxu1 %vm10786_vm3, %v10783_v0 }
 0xd2b   :  { %10465 = vmatprep.subr.bf16.mxu1 %v10785_v58 }
 0xd31   :  { %9821 = vmatmul.mubr.f32.vlgmr.msra.gmra.mrb[10].mxu1 %v7207_v2  ;;  %v10472_v2 = vpack.c.bf16 %v8186_v43, %v8179_v38 }
 0xd32   :  { %9893 = vmatprep.mubr.msk.f32.mxu1 %vm10786_vm3, %v10783_v0  ;;  %10467 = vmatpush3.bf16.msra.mxu1 %v10466_v57 }
 0xd33   :  { %10468 = vmatprep.subr.bf16.mxu1 %v10785_v58 }
 0xe04   :  { %v7595_v61 = vpop.f32.mrb[10].mxu1 }
 0xe05   :  { %v10484_v37 = vadd.f32 %v7595_v61, %v7136_v39  ;;  %v9822_v19 = vpop.f32.mrb[11].mxu1 }
 0xe07   :  { %v7599_v29 = vmax.f32 %v10484_v37, 0.0 }
 0xe09   :  { %v7606_v10 = vsel %vm4286_vm7, %v7599_v29, 0 }
 0xe0a   :  { %v7677_v14 = vand.u32 4294901760, %v7606_v10 }
 0xe0c   :  { %v7678_v20 = vsub.f32 %v7606_v10, %v7677_v14 }
 0xe0e   :  { %v7679_v51 = vand.u32 4294901760, %v7678_v20 }
 0xe10   :  { %v7680_v35 = vsub.f32 %v7678_v20, %v7679_v51 }
 0xe12   :  { %v7681_v1 = vand.u32 4294901760, %v7680_v35 }
 0xe14   :  { %9832 = vmatmul.mubr.f32.vlgmr.msra.gmra.mrb[18].mxu0 %v7681_v1 }
 0xe15   :  { %10437 = vmatpush3.bf16.msra.mxu0 %v10436_v31  ;;  %9842 = vmatprep.mubr.msk.f32.mxu0 %vm10786_vm3, %v10783_v0 }
 0xe16   :  { %10438 = vmatprep.subr.bf16.mxu0 %v10785_v58 }
 0xe19   :  { %10440 = vmatpush3.bf16.msra.mxu0 %v10439_v33 }
 0xe1a   :  { %10441 = vmatprep.subr.bf16.mxu0 %v10785_v58 }
 0xe1c   :  { %9843 = vmatmul.mubr.f32.vlgmr.msra.gmra.mrb[18].mxu0 %v7677_v14 }
 0xe1d   :  { %10443 = vmatpush3.bf16.msra.mxu0 %v10442_v54  ;;  %9853 = vmatprep.mubr.msk.f32.mxu0 %vm10786_vm3, %v10783_v0 }
 0xe1e   :  { %10444 = vmatprep.subr.bf16.mxu0 %v10785_v58 }
 0xe21   :  { %10446 = vmatpush3.bf16.msra.mxu0 %v10445_v46 }
 0xe22   :  { %10447 = vmatprep.subr.bf16.mxu0 %v10785_v58 }
 0xe24   :  { %9854 = vmatmul.mubr.f32.vlgmr.msra.gmra.mrb[18].mxu0 %v7678_v20 }
 0xe25   :  { %10449 = vmatpush3.bf16.msra.mxu0 %v11802_v26  ;;  %9864 = vmatprep.mubr.msk.f32.mxu0 %vm10786_vm3, %v10783_v0 }
 0xe26   :  { %10450 = vmatprep.subr.bf16.mxu0 %v10785_v58 }
 0xe29   :  { %10452 = vmatpush3.bf16.msra.mxu0 %v10433_v59 }
 0xe2a   :  { %10453 = vmatprep.subr.bf16.mxu0 %v10785_v58 }
 0xe2c   :  { %9865 = vmatmul.mubr.f32.vlgmr.msra.gmra.mrb[18].mxu0 %v7679_v51 }
 0xe2d   :  { %10455 = vmatpush3.bf16.msra.mxu0 %v10454_v15  ;;  %9875 = vmatprep.mubr.msk.f32.mxu0 %vm10786_vm3, %v10783_v0 }
 0xe2e   :  { %10456 = vmatprep.subr.bf16.mxu0 %v10785_v58 }
 0xe31   :  { %10458 = vmatpush3.bf16.msra.mxu0 %v10457_v24 }
 0xe32   :  { %10459 = vmatprep.subr.bf16.mxu0 %v10785_v58 }
 0xe34   :  { %9876 = vmatmul.mubr.f32.vlgmr.msra.gmra.mrb[18].mxu0 %v7677_v14 }
 0xe35   :  { %10461 = vmatpush3.bf16.msra.mxu0 %v11802_v26  ;;  %9886 = vmatprep.mubr.msk.f32.mxu0 %vm10786_vm3, %v10783_v0 }
 0xe36   :  { %10462 = vmatprep.subr.bf16.mxu0 %v10785_v58 }
 0xe39   :  { %10464 = vmatpush3.bf16.msra.mxu0 %v10433_v59 }
 0xe3c   :  { %9887 = vmatmul.mubr.f32.vlgmr.msra.gmra.mrb[18].mxu0 %v7677_v14 }
 0xf0f   :  { %v8089_v5 = vpop.f32.mrb[18].mxu0 }
 0xf10   :  { %v10485_v7 = vadd.f32 %v8089_v5, %v7604_v3  ;;  %v9888_v8 = vpop.f32.mrb[19].mxu0 }
 0xf12   :  { %v8093_v27 = vmax.f32 %v10485_v7, 0.0 }
 0xf14   :  { %v8098_v23 = vsel %vm3219_vm6, %v8093_v27, 0  ;;  %8561 = vst.msk [vmem:[#allocation6] sm:$0x3] %vm8560_vm11, %v8093_v27 }
 0xf15   :  { %v8167_v11 = vand.u32 4294901760, %v8098_v23 }
 0xf17   :  { %v8168_v26 = vsub.f32 %v8098_v23, %v8167_v11 }
 0xf19   :  { %v8169_v40 = vand.u32 4294901760, %v8168_v26 }
 0xf1b   :  { %v8170_v41 = vsub.f32 %v8168_v26, %v8169_v40 }
 0xf1d   :  { %v8171_v42 = vand.u32 4294901760, %v8170_v41 }
 0xf1f   :  { %9894 = vmatmul.mubr.f32.vlgmr.msra.gmra.mrb[12].mxu1 %v8171_v42 }
 0xf20   :  { %10470 = vmatpush3.bf16.msra.mxu1 %v10469_v18  ;;  %9900 = vmatprep.mubr.msk.f32.mxu1 %vm10786_vm3, %v10783_v0 }
 0xf21   :  { %10471 = vmatprep.subr.bf16.mxu1 %v10785_v58 }
 0xf27   :  { %9901 = vmatmul.mubr.f32.vlgmr.msra.gmra.mrb[12].mxu1 %v8167_v11 }
 0xf28   :  { %10473 = vmatpush3.bf16.msra.mxu1 %v10472_v2  ;;  %9907 = vmatprep.mubr.msk.f32.mxu1 %vm10786_vm3, %v10783_v0 }
 0xf29   :  { %10474 = vmatprep.subr.bf16.mxu1 %v10785_v58 }
 0xf2f   :  { %9908 = vmatmul.mubr.f32.vlgmr.msra.gmra.mrb[12].mxu1 %v8168_v26 }
 0xf30   :  { %10476 = vmatpush3.bf16.msra.mxu1 %v10466_v57  ;;  %9914 = vmatprep.mubr.msk.f32.mxu1 %vm10786_vm3, %v10783_v0 }
 0xf31   :  { %10477 = vmatprep.subr.bf16.mxu1 %v10785_v58 }
 0xf37   :  { %9915 = vmatmul.mubr.f32.vlgmr.msra.gmra.mrb[12].mxu1 %v8169_v40 }
 0xf38   :  { %10479 = vmatpush3.bf16.msra.mxu1 %v10478_v6  ;;  %9921 = vmatprep.mubr.msk.f32.mxu1 %vm10786_vm3, %v10783_v0 }
 0xf39   :  { %10480 = vmatprep.subr.bf16.mxu1 %v10785_v58 }
 0xf3f   :  { %9922 = vmatmul.mubr.f32.vlgmr.msra.gmra.mrb[12].mxu1 %v8167_v11 }
 0xf40   :  { %10482 = vmatpush3.bf16.msra.mxu1 %v10466_v57  ;;  %9928 = vmatprep.mubr.msk.f32.mxu1 %vm10786_vm3, %v10783_v0 }
 0xf47   :  { %9929 = vmatmul.mubr.f32.vlgmr.msra.gmra.mrb[12].mxu1 %v8167_v11 }
 0xf48   :  { %10741 = shalt.err (!%p10738_p12)
}
 0xf49   :  { %s10742_s15 = scalar_lea.hbm %s11872_s3, 32 }
 0xf4a   :  { %p10743_p13 = scmp.ne.s32.totalorder %s11872_s3, %s10742_s15  ;;  %p10746_p0 = scmp.lt.u32.totalorder %s10742_s15, %s11872_s3 }
 0xf4c   :  { %p10748_p1 = pnand %p10746_p0, %p10743_p13 }
 0xf4e   :  { %10751 = shalt.err (!%p10748_p1)
}
 0xf4f   :  { %8583 = dma.vmem_to_hbm [thread:$0]  %s8581_s11, 32, %s11872_s3, [#allocation7]   ;;  %v8096_v0 = vld [vmem:[#allocation2 + $0x380] ss:$0 sm:$0xff]  ;;  %vm8562_vm12 = vcmask 33792  }
 0xf50   :  { %s10790_s22 = smov [#allocation5]  }
 0xf51   :  { %s8570_s23 = sshll.u32 %s10790_s22, 4  ;;  %s8571_s23 = int_to_ptr.vmem [resolvable:$true] %s8570_s23 }
 0xf52   :  { %s10752_s24 = scalar_lea.vmem %s8571_s23, 32  ;;  %p10757_p3 = scmp.lt.s32.totalorder %s8571_s23, %s8571_s23 }
 0xf53   :  { %p10753_p2 = scmp.ne.s32.totalorder %s8571_s23, %s10752_s24  ;;  %p10758_p4 = scmp.lt.s32.totalorder %s10752_s24, %s10752_s24 }
 0xf55   :  { %p10759_p5 = por %p10758_p4, %p10757_p3 }
 0xf57   :  { %p10760_p6 = pnand %p10759_p5, %p10753_p2 }
0x101a   :  { %v8555_v58 = vpop.f32.mrb[12].mxu1 }
0x101b   :  { %v10486_v25 = vadd.f32 %v8555_v58, %v8096_v0  ;;  %v9930_v47 = vpop.f32.mrb[13].mxu1 }
0x101d   :  { %v8559_v48 = vmax.f32 %v10486_v25, 0.0 }
0x101f   :  { %8563 = vst.msk [vmem:[#allocation5] sm:$0x3] %vm8562_vm12, %v8559_v48 }
0x1020   :  { %10763 = shalt.err (!%p10760_p6)
}
0x1021   :  { %s10764_s3 = scalar_lea.hbm %s11871_s2, 32 }
0x1022   :  { %p10765_p7 = scmp.ne.s32.totalorder %s11871_s2, %s10764_s3  ;;  %p10768_p8 = scmp.lt.u32.totalorder %s10764_s3, %s11871_s2 }
0x1024   :  { %p10770_p9 = pnand %p10768_p8, %p10765_p7 }
0x1026   :  { %10773 = shalt.err (!%p10770_p9)
}
0x1027   :  { %8573 = dma.vmem_to_hbm [thread:$0]  %s8571_s23, 32, %s11871_s2, [#allocation4]  }
0x1028   :  { %10776 = dma.done.wait [#allocation4], 32  }
0x1029   :  { %10777 = vsyncadd [#allocation4], 4294967264 }
0x102a   :  { %10778 = dma.done.wait [#allocation7], 32  }
0x102b   :  { %10779 = vsyncadd [#allocation7], 4294967264 }
0x102c   :  { %8590 = vsyncpa [#allocation3], 1 }
0x102d   :  { %8591 = vsyncpa [#allocation4], 1 }
0x102e   :  { %8592 = vsyncpa [#allocation7], 1 }

</bundles_post_ra>
